<compile_context>
chip_gen: v7x
topology: tpu7x:2x2x1
jax: 0.10.0
libtpu: 0.0.40
codegen_flags: <defaults>
</compile_context>

<pallas_src>
import jax
import jax.numpy as jnp
from jax.experimental import pallas as pl
from jax.experimental.pallas import tpu as pltpu

IN_DIM = 2048
H1_DIM = 512
H2_DIM = 128
OUT_DIM = 8
OUT_PAD = 128   # lane-dense padded fc3 width (sliced back to OUT_DIM in wrapper)
_MIB = 1024 * 1024


def _round_up(x, m):
    return (x + m - 1) // m * m


def _tpu_vmem_capacity_bytes():
    """Physical per-core VMEM; conservative 64 MiB (v7x-sized) fallback."""
    try:
        return int(pltpu.get_tpu_info().vmem_capacity_bytes)
    except Exception:
        return 64 * _MIB


def _mlp_kernel(x_ref, w1_ref, b1_ref, w2_ref, b2_ref, w3_ref, b3_ref, o_ref):
    # x arrives in f32 straight from HBM; cast to bf16 here (VPU work hidden
    # under the fc1 MXU push) instead of a separate wrapper-side HBM pass.
    x = x_ref[...].astype(jnp.bfloat16)
    # fc1 + bias + ReLU   (dropout1: identity in eval mode)
    h1 = jnp.dot(x, w1_ref[...], preferred_element_type=jnp.float32)
    h1 = jnp.maximum(h1 + b1_ref[...], 0.0)
    # fc2 + bias + ReLU   (dropout2 has p=0 -> identity in all modes)
    h2 = jnp.dot(h1.astype(jnp.bfloat16), w2_ref[...],
                 preferred_element_type=jnp.float32)
    h2 = jnp.maximum(h2 + b2_ref[...], 0.0)
    # fc3 (output padded to 128 lanes -> unmasked lane-dense stores)
    out = jnp.dot(h2.astype(jnp.bfloat16), w3_ref[...],
                  preferred_element_type=jnp.float32)
    o_ref[...] = (out + b3_ref[...]).astype(o_ref.dtype)


def prepare_params(params):
    """One-time conversion: bf16 weights (w (in,out)), f32 biases (1,out),
    fc3 lane-padded to 128 outputs.  Keep the result around across calls so no
    per-call cast/pad ops exist."""
    w3, b3 = params["w3"], params["b3"]
    if w3.shape[-1] != OUT_PAD:
        w3 = jnp.pad(w3, ((0, 0), (0, OUT_PAD - w3.shape[-1])))
        b3 = jnp.pad(b3, ((0, 0), (0, OUT_PAD - b3.shape[-1])))
    return {
        "w1": params["w1"].astype(jnp.bfloat16),
        "b1": params["b1"].astype(jnp.float32),
        "w2": params["w2"].astype(jnp.bfloat16),
        "b2": params["b2"].astype(jnp.float32),
        "w3": w3.astype(jnp.bfloat16),
        "b3": b3.astype(jnp.float32),
    }


def simple_nn_forward(x, params, *, batch_tile=None):
    """x: (B, 2048) float32.  params: raw (init_params) or prepared
    (prepare_params).  Returns (B, 8) float32 logits (eval-mode forward)."""
    if params["w3"].shape[-1] != OUT_PAD or params["w1"].dtype != jnp.bfloat16:
        params = prepare_params(params)
    w1, b1 = params["w1"], params["b1"]
    w2, b2 = params["w2"], params["b2"]
    w3, b3 = params["w3"], params["b3"]

    B = x.shape[0]
    x = x.astype(jnp.float32)   # no-op for f32 inputs; bf16 cast happens in-kernel

    vmem_cap = _tpu_vmem_capacity_bytes()
    big_vmem = vmem_cap >= 100 * _MIB                       # v5e/v6e-class (128 MiB)
    vmem_limit = int(min(64 * _MIB, max(32 * _MIB, (vmem_cap * 3) // 5)))

    # Batch tile: big enough to amortize ~0.35 us/grid-step overhead, capped
    # for small batches; on 64-MiB-VMEM (2-TC, v7x) parts also capped so the
    # "parallel" grid axis has >= 2 steps whenever B allows.
    bt = batch_tile if batch_tile is not None else (1024 if big_vmem else 512)
    bt = min(bt, _round_up(B, 8))
    if not big_vmem and B >= 16:
        bt = min(bt, _round_up((B + 1) // 2, 8))
    bt = _round_up(max(bt, 8), 8)
    if bt >= 16:
        bt = _round_up(bt, 16)   # keep bf16 output blocks on native (16,128) tiles
    grid = (pl.cdiv(B, bt),)

    # bf16 writeback (lane-dense, 128 wide) halves output HBM traffic; keep
    # f32 for tiny tiles so no bf16 block sits below the native (16,128) tile.
    out_dtype = jnp.bfloat16 if bt >= 16 else jnp.float32
    out_itemsize = 2 if out_dtype == jnp.bfloat16 else 4

    def x_map(i):
        return (i, 0)

    def const_map(i):
        return (0, 0)

    flops = 2 * B * (IN_DIM * H1_DIM + H1_DIM * H2_DIM + H2_DIM * OUT_PAD)
    bytes_accessed = (
        B * IN_DIM * 4                                                 # x stream (f32)
        + (IN_DIM * H1_DIM + H1_DIM * H2_DIM + H2_DIM * OUT_PAD) * 2   # weights (bf16)
        + (H1_DIM + H2_DIM + OUT_PAD) * 4                              # biases (f32)
        + B * OUT_PAD * out_itemsize                                   # output
    )

    out = pl.pallas_call(
        _mlp_kernel,
        out_shape=jax.ShapeDtypeStruct((B, OUT_PAD), out_dtype),
        grid_spec=pltpu.PrefetchScalarGridSpec(
            num_scalar_prefetch=0,
            grid=grid,
            in_specs=[
                pl.BlockSpec((bt, IN_DIM), x_map),
                pl.BlockSpec((IN_DIM, H1_DIM), const_map),
                pl.BlockSpec((1, H1_DIM), const_map),
                pl.BlockSpec((H1_DIM, H2_DIM), const_map),
                pl.BlockSpec((1, H2_DIM), const_map),
                pl.BlockSpec((H2_DIM, OUT_PAD), const_map),
                pl.BlockSpec((1, OUT_PAD), const_map),
            ],
            out_specs=pl.BlockSpec((bt, OUT_PAD), x_map),
        ),
        compiler_params=pltpu.CompilerParams(
            dimension_semantics=("parallel",),
            vmem_limit_bytes=vmem_limit,
        ),
        cost_estimate=pl.CostEstimate(
            flops=flops, transcendentals=0, bytes_accessed=int(bytes_accessed)
        ),
    )(x, w1, b1, w2, b2, w3, b3)

    return out[:, :OUT_DIM].astype(jnp.float32)


def init_params(key):
    """Deterministic init mirroring nn.Linear's U(-1/sqrt(fan_in), 1/sqrt(fan_in)).
    Weights stored transposed vs. PyTorch: (in, out), so y = x @ W + b."""
    ks = jax.random.split(key, 6)

    def linear(kw, kb, fan_in, fan_out):
        bound = 1.0 / jnp.sqrt(fan_in)
        w = jax.random.uniform(kw, (fan_in, fan_out), jnp.float32, -bound, bound)
        b = jax.random.uniform(kb, (1, fan_out), jnp.float32, -bound, bound)
        return w, b

    w1, b1 = linear(ks[0], ks[1], IN_DIM, H1_DIM)
    w2, b2 = linear(ks[2], ks[3], H1_DIM, H2_DIM)
    w3, b3 = linear(ks[4], ks[5], H2_DIM, OUT_DIM)
    return {"w1": w1, "b1": b1, "w2": w2, "b2": b2, "w3": w3, "b3": b3}


def reference_forward_bf16(x, p):
    """Pure-JAX reference with the same bf16-operand / f32-accumulation numerics."""
    xb = x.astype(jnp.bfloat16)
    w1 = p["w1"].astype(jnp.bfloat16)
    w2 = p["w2"].astype(jnp.bfloat16)
    w3 = p["w3"].astype(jnp.bfloat16)
    h1 = jnp.maximum(
        jnp.dot(xb, w1, preferred_element_type=jnp.float32) + p["b1"], 0.0)
    h2 = jnp.maximum(
        jnp.dot(h1.astype(jnp.bfloat16), w2, preferred_element_type=jnp.float32)
        + p["b2"], 0.0)
    return (jnp.dot(h2.astype(jnp.bfloat16), w3, preferred_element_type=jnp.float32)
            + p["b3"])


if __name__ == "__main__":
    key = jax.random.PRNGKey(0)
    k_x, k_p, k_x2 = jax.random.split(key, 3)

    params = init_params(k_p)
    prepared = prepare_params(params)   # one-time bf16/pad conversion

    # Small aligned batch.
    B = 8
    x = jax.random.normal(k_x, (B, IN_DIM), jnp.float32)
    out = jax.block_until_ready(simple_nn_forward(x, prepared))
    ref = reference_forward_bf16(x, params)
    assert out.shape == (B, OUT_DIM)
    assert jnp.allclose(out, ref, atol=2e-2, rtol=2e-2), "mismatch (B=8)"

    # Ragged batch (B not a multiple of the tile): exercises the no-pad edge
    # block path (stale rows in the last tile are row-independent and dropped).
    B2 = 20
    x2 = jax.random.normal(k_x2, (B2, IN_DIM), jnp.float32)
    out2 = jax.block_until_ready(simple_nn_forward(x2, prepared))
    ref2 = reference_forward_bf16(x2, params)
    assert out2.shape == (B2, OUT_DIM)
    assert jnp.allclose(out2, ref2, atol=2e-2, rtol=2e-2), "mismatch (B=20)"

    print("KERNEL_OK")
</pallas_src>

<mosaic_0001>
module attributes {stable_mosaic.version = 11 : i64} {
  func.func @_mlp_kernel(%arg0: i32, %arg1: memref<8x2048xf32, #tpu.memory_space<vmem>>, %arg2: memref<2048x512xbf16, #tpu.memory_space<vmem>>, %arg3: memref<1x512xf32, #tpu.memory_space<vmem>>, %arg4: memref<512x128xbf16, #tpu.memory_space<vmem>>, %arg5: memref<1x128xf32, #tpu.memory_space<vmem>>, %arg6: memref<128x128xbf16, #tpu.memory_space<vmem>>, %arg7: memref<1x128xf32, #tpu.memory_space<vmem>>, %arg8: memref<8x128xf32, #tpu.memory_space<vmem>>) attributes {dimension_semantics = [#tpu.dimension_semantics<parallel>], iteration_bounds = array<i64: 1>, scalar_prefetch = 0 : i64, scratch_operands = 0 : i64, tpu.core_type = #tpu.core_type<tc>, window_params = [{transform_indices = @transform_0, window_bounds = array<i64: 8, 2048>}, {pipeline_mode = #tpu.pipeline_mode<synchronous>, transform_indices = @transform_1, window_bounds = array<i64: 2048, 512>}, {pipeline_mode = #tpu.pipeline_mode<synchronous>, transform_indices = @transform_2, window_bounds = array<i64: 1, 512>}, {pipeline_mode = #tpu.pipeline_mode<synchronous>, transform_indices = @transform_3, window_bounds = array<i64: 512, 128>}, {pipeline_mode = #tpu.pipeline_mode<synchronous>, transform_indices = @transform_4, window_bounds = array<i64: 1, 128>}, {pipeline_mode = #tpu.pipeline_mode<synchronous>, transform_indices = @transform_5, window_bounds = array<i64: 128, 128>}, {pipeline_mode = #tpu.pipeline_mode<synchronous>, transform_indices = @transform_6, window_bounds = array<i64: 1, 128>}, {transform_indices = @transform_7, window_bounds = array<i64: 8, 128>}]} {
    %c0 = arith.constant 0 : index
    %c0_0 = arith.constant 0 : index
    %0 = vector.load %arg1[%c0, %c0_0] : memref<8x2048xf32, #tpu.memory_space<vmem>>, vector<8x2048xf32>
    %1 = arith.truncf %0 : vector<8x2048xf32> to vector<8x2048xbf16>
    %c0_1 = arith.constant 0 : index
    %c0_2 = arith.constant 0 : index
    %2 = vector.load %arg2[%c0_1, %c0_2] : memref<2048x512xbf16, #tpu.memory_space<vmem>>, vector<2048x512xbf16>
    %cst = arith.constant dense<0.000000e+00> : vector<8x512xf32>
    %3 = tpu.matmul %1, %2, %cst {dimension_numbers = #tpu.dot_dimension_numbers<[1], [0], [0], [1], [0, 0, 1, 1], [], []>} : vector<8x2048xbf16>, vector<2048x512xbf16>, vector<8x512xf32> -> vector<8x512xf32>
    %c0_3 = arith.constant 0 : index
    %c0_4 = arith.constant 0 : index
    %4 = vector.load %arg3[%c0_3, %c0_4] : memref<1x512xf32, #tpu.memory_space<vmem>>, vector<1x512xf32>
    %5 = vector.broadcast %4 : vector<1x512xf32> to vector<8x512xf32>
    %6 = arith.addf %3, %5 : vector<8x512xf32>
    %cst_5 = arith.constant 0.000000e+00 : f32
    %7 = vector.broadcast %cst_5 : f32 to vector<8x512xf32>
    %8 = arith.maximumf %6, %7 : vector<8x512xf32>
    %9 = arith.truncf %8 : vector<8x512xf32> to vector<8x512xbf16>
    %c0_6 = arith.constant 0 : index
    %c0_7 = arith.constant 0 : index
    %10 = vector.load %arg4[%c0_6, %c0_7] : memref<512x128xbf16, #tpu.memory_space<vmem>>, vector<512x128xbf16>
    %cst_8 = arith.constant dense<0.000000e+00> : vector<8x128xf32>
    %11 = tpu.matmul %9, %10, %cst_8 {dimension_numbers = #tpu.dot_dimension_numbers<[1], [0], [0], [1], [0, 0, 1, 1], [], []>} : vector<8x512xbf16>, vector<512x128xbf16>, vector<8x128xf32> -> vector<8x128xf32>
    %c0_9 = arith.constant 0 : index
    %c0_10 = arith.constant 0 : index
    %12 = vector.load %arg5[%c0_9, %c0_10] : memref<1x128xf32, #tpu.memory_space<vmem>>, vector<1x128xf32>
    %13 = vector.broadcast %12 : vector<1x128xf32> to vector<8x128xf32>
    %14 = arith.addf %11, %13 : vector<8x128xf32>
    %cst_11 = arith.constant 0.000000e+00 : f32
    %15 = vector.broadcast %cst_11 : f32 to vector<8x128xf32>
    %16 = arith.maximumf %14, %15 : vector<8x128xf32>
    %17 = arith.truncf %16 : vector<8x128xf32> to vector<8x128xbf16>
    %c0_12 = arith.constant 0 : index
    %c0_13 = arith.constant 0 : index
    %18 = vector.load %arg6[%c0_12, %c0_13] : memref<128x128xbf16, #tpu.memory_space<vmem>>, vector<128x128xbf16>
    %cst_14 = arith.constant dense<0.000000e+00> : vector<8x128xf32>
    %19 = tpu.matmul %17, %18, %cst_14 {dimension_numbers = #tpu.dot_dimension_numbers<[1], [0], [0], [1], [0, 0, 1, 1], [], []>} : vector<8x128xbf16>, vector<128x128xbf16>, vector<8x128xf32> -> vector<8x128xf32>
    %c0_15 = arith.constant 0 : index
    %c0_16 = arith.constant 0 : index
    %20 = vector.load %arg7[%c0_15, %c0_16] : memref<1x128xf32, #tpu.memory_space<vmem>>, vector<1x128xf32>
    %21 = vector.broadcast %20 : vector<1x128xf32> to vector<8x128xf32>
    %22 = arith.addf %19, %21 : vector<8x128xf32>
    %c0_17 = arith.constant 0 : index
    %c0_18 = arith.constant 0 : index
    %23 = vector.load %arg8[%c0_17, %c0_18] : memref<8x128xf32, #tpu.memory_space<vmem>>, vector<8x128xf32>
    tpu.vector_store %arg8[%c0_17, %c0_18], %22 {strides = array<i32>} : memref<8x128xf32, #tpu.memory_space<vmem>>, vector<8x128xf32>,
    return
  }
  func.func @transform_0(%arg0: i32) -> (i32, i32) {
    %c0_i32 = arith.constant 0 : i32
    %c0_i32_0 = arith.constant 0 : i32
    return %arg0, %c0_i32 : i32, i32
  }
  func.func @transform_1(%arg0: i32) -> (i32, i32) {
    %c0_i32 = arith.constant 0 : i32
    %c0_i32_0 = arith.constant 0 : i32
    %c0_i32_1 = arith.constant 0 : i32
    return %c0_i32, %c0_i32_0 : i32, i32
  }
  func.func @transform_2(%arg0: i32) -> (i32, i32) {
    %c0_i32 = arith.constant 0 : i32
    %c0_i32_0 = arith.constant 0 : i32
    %c0_i32_1 = arith.constant 0 : i32
    return %c0_i32, %c0_i32_0 : i32, i32
  }
  func.func @transform_3(%arg0: i32) -> (i32, i32) {
    %c0_i32 = arith.constant 0 : i32
    %c0_i32_0 = arith.constant 0 : i32
    %c0_i32_1 = arith.constant 0 : i32
    return %c0_i32, %c0_i32_0 : i32, i32
  }
  func.func @transform_4(%arg0: i32) -> (i32, i32) {
    %c0_i32 = arith.constant 0 : i32
    %c0_i32_0 = arith.constant 0 : i32
    %c0_i32_1 = arith.constant 0 : i32
    return %c0_i32, %c0_i32_0 : i32, i32
  }
  func.func @transform_5(%arg0: i32) -> (i32, i32) {
    %c0_i32 = arith.constant 0 : i32
    %c0_i32_0 = arith.constant 0 : i32
    %c0_i32_1 = arith.constant 0 : i32
    return %c0_i32, %c0_i32_0 : i32, i32
  }
  func.func @transform_6(%arg0: i32) -> (i32, i32) {
    %c0_i32 = arith.constant 0 : i32
    %c0_i32_0 = arith.constant 0 : i32
    %c0_i32_1 = arith.constant 0 : i32
    return %c0_i32, %c0_i32_0 : i32, i32
  }
  func.func @transform_7(%arg0: i32) -> (i32, i32) {
    %c0_i32 = arith.constant 0 : i32
    %c0_i32_0 = arith.constant 0 : i32
    return %arg0, %c0_i32 : i32, i32
  }
}

</mosaic_0001>

<bundles_post_ra>
// kernel: tpu_custom_call.1
= control target key start
LH: loop header
LB: loop body
LE: loop exit
PB: predicated region body
PF: predicated region fallthrough
CT: control target
= control target key end

     0   :  { %12 = vsyncpa [#allocation3], 0  ;;  %s6225_s0 = inlined_call_operand.hbm [shape: f32[8,2048], index: 0, kind: input, shape index: {}]   ;;  %s6226_s1 = inlined_call_operand.hbm [shape: bf16[2048,512], index: 1, kind: input, shape index: {}]   ;;  %s6227_s2 = inlined_call_operand.hbm [shape: f32[1,512], index: 2, kind: input, shape index: {}]   ;;  %s6228_s3 = inlined_call_operand.hbm [shape: bf16[512,128], index: 3, kind: input, shape index: {}]   ;;  %s6229_s4 = inlined_call_operand.hbm [shape: f32[1,128], index: 4, kind: input, shape index: {}]   ;;  %s6230_s5 = inlined_call_operand.hbm [shape: bf16[128,128], index: 5, kind: input, shape index: {}]   ;;  %s6231_s6 = inlined_call_operand.hbm [shape: f32[1,128], index: 6, kind: input, shape index: {}]   ;;  %s6232_s7 = inlined_call_operand.hbm [shape: f32[8,128], index: 7, kind: output, shape index: {}]  }
   0x1   :  { %13 = vsyncpa [#allocation6], 0 }
   0x2   :  { %14 = vsyncpa [#allocation9], 0 }
   0x3   :  { %15 = vsyncpa [#allocation12], 0 }
   0x4   :  { %16 = vsyncpa [#allocation4], 0  ;;  %s6075_s24 = smov [#allocation5]   ;;  %s5889_s28 = scalar_lea.hbm %s6226_s1, 65536 }
   0x5   :  { %s32_s25 = sshll.u32 %s6075_s24, 4  ;;  %p5890_p0 = scmp.ne.s32.totalorder %s6226_s1, %s5889_s28  ;;  %s33_s25 = int_to_ptr.vmem [resolvable:$true] %s32_s25 }
   0x6   :  { %p5893_p1 = scmp.lt.u32.totalorder %s5889_s28, %s6226_s1 }
   0x8   :  { %p5895_p2 = pnand %p5893_p1, %p5890_p0 }
   0xa   :  { %5898 = shalt.err (!%p5895_p2)
}
   0xb   :  { %s5899_s10 = scalar_lea.vmem %s33_s25, 65536  ;;  %p5904_p4 = scmp.lt.s32.totalorder %s33_s25, %s33_s25 }
   0xc   :  { %p5900_p3 = scmp.ne.s32.totalorder %s33_s25, %s5899_s10  ;;  %p5905_p5 = scmp.lt.s32.totalorder %s5899_s10, %s5899_s10 }
   0xe   :  { %p5906_p6 = por %p5905_p5, %p5904_p4 }
  0x10   :  { %p5907_p7 = pnand %p5906_p6, %p5900_p3 }
  0x12   :  { %5910 = shalt.err (!%p5907_p7)
}
  0x13   :  { %s6076_s11 = smov 256   ;;  %s6077_s12 = smov 16  }
  0x14   :  { %38 = dma.hbm_to_vmem [thread:$0]  %s6226_s1, 65536, %s33_s25, [#allocation6], %s6076_s11, %s6076_s11, %s6077_s12  }
  0x15   :  { %s6078_s15 = smov [#allocation8]   ;;  %s5911_s19 = scalar_lea.hbm %s6228_s3, 4096 }
  0x16   :  { %s54_s16 = sshll.u32 %s6078_s15, 4  ;;  %p5912_p8 = scmp.ne.s32.totalorder %s6228_s3, %s5911_s19  ;;  %s55_s16 = int_to_ptr.vmem [resolvable:$true] %s54_s16 }
  0x17   :  { %p5915_p9 = scmp.lt.u32.totalorder %s5911_s19, %s6228_s3 }
  0x19   :  { %p5917_p10 = pnand %p5915_p9, %p5912_p8 }
  0x1b   :  { %5920 = shalt.err (!%p5917_p10)
}
  0x1c   :  { %s5921_s24 = scalar_lea.vmem %s55_s16, 4096  ;;  %p5926_p12 = scmp.lt.s32.totalorder %s55_s16, %s55_s16 }
  0x1d   :  { %p5922_p11 = scmp.ne.s32.totalorder %s55_s16, %s5921_s24  ;;  %p5927_p13 = scmp.lt.s32.totalorder %s5921_s24, %s5921_s24 }
  0x1f   :  { %p5928_p0 = por %p5927_p13, %p5926_p12 }
  0x21   :  { %p5929_p1 = pnand %p5928_p0, %p5922_p11 }
  0x23   :  { %5932 = shalt.err (!%p5929_p1)
}
  0x24   :  { %s6079_s1 = smov 64   ;;  %s6080_s25 = smov 4  }
  0x25   :  { %60 = dma.hbm_to_vmem [thread:$0]  %s6228_s3, 4096, %s55_s16, [#allocation9], %s6079_s1, %s6079_s1, %s6080_s25  }
  0x26   :  { %s6081_s28 = smov [#allocation11]   ;;  %s6082_s30 = smov [#allocation2]  }
  0x27   :  { %s76_s29 = sshll.u32 %s6081_s28, 4  ;;  %s23_s8 = sshll.u32 %s6082_s30, 4  ;;  %s77_s29 = int_to_ptr.vmem [resolvable:$true] %s76_s29  ;;  %s24_s8 = int_to_ptr.vmem [resolvable:$true] %s23_s8 }
  0x28   :  { %s5933_s11 = scalar_lea.hbm %s6230_s5, 1024 }
  0x29   :  { %p5934_p2 = scmp.ne.s32.totalorder %s6230_s5, %s5933_s11  ;;  %p5937_p3 = scmp.lt.u32.totalorder %s5933_s11, %s6230_s5 }
  0x2b   :  { %p5939_p4 = pnand %p5937_p3, %p5934_p2 }
  0x2d   :  { %5942 = shalt.err (!%p5939_p4)
}
  0x2e   :  { %s5943_s3 = scalar_lea.vmem %s77_s29, 1024  ;;  %p5948_p6 = scmp.lt.s32.totalorder %s77_s29, %s77_s29 }
  0x2f   :  { %p5944_p5 = scmp.ne.s32.totalorder %s77_s29, %s5943_s3  ;;  %p5949_p7 = scmp.lt.s32.totalorder %s5943_s3, %s5943_s3 }
  0x31   :  { %p5950_p8 = por %p5949_p7, %p5948_p6 }
  0x33   :  { %p5951_p9 = pnand %p5950_p8, %p5944_p5 }
  0x35   :  { %5954 = shalt.err (!%p5951_p9)
}
  0x36   :  { %82 = dma.hbm_to_vmem [thread:$0]  %s6230_s5, 1024, %s77_s29, [#allocation12], %s6079_s1, %s6079_s1, %s6080_s25  }
  0x37   :  { %s5955_s20 = scalar_lea.hbm %s6225_s0, 2048 }
  0x38   :  { %p5956_p10 = scmp.ne.s32.totalorder %s6225_s0, %s5955_s20  ;;  %p5959_p11 = scmp.lt.u32.totalorder %s5955_s20, %s6225_s0 }
  0x3a   :  { %p5961_p12 = pnand %p5959_p11, %p5956_p10 }
  0x3c   :  { %5964 = shalt.err (!%p5961_p12)
}
  0x3d   :  { %s5965_s26 = scalar_lea.vmem %s24_s8, 2048  ;;  %p5970_p0 = scmp.lt.s32.totalorder %s24_s8, %s24_s8 }
  0x3e   :  { %p5966_p13 = scmp.ne.s32.totalorder %s24_s8, %s5965_s26  ;;  %p5971_p1 = scmp.lt.s32.totalorder %s5965_s26, %s5965_s26 }
  0x40   :  { %p5972_p2 = por %p5971_p1, %p5970_p0 }
  0x42   :  { %p5973_p3 = pnand %p5972_p2, %p5966_p13 }
  0x44   :  { %5976 = shalt.err (!%p5973_p3)
}
  0x45   :  { %26 = dma.hbm_to_vmem [thread:$0]  %s6225_s0, 2048, %s24_s8, [#allocation3]  }
  0x46   :  { %s6083_s25 = smov [#allocation7]   ;;  %s6084_s28 = smov [#allocation10]  }
  0x47   :  { %s45_s27 = sshll.u32 %s6083_s25, 4  ;;  %s67_s29 = sshll.u32 %s6084_s28, 4  ;;  %s46_s27 = int_to_ptr.vmem [resolvable:$true] %s45_s27  ;;  %s68_s29 = int_to_ptr.vmem [resolvable:$true] %s67_s29 }
  0x48   :  { %s5977_s10 = scalar_lea.hbm %s6227_s2, 64 }
  0x49   :  { %p5978_p4 = scmp.ne.s32.totalorder %s6227_s2, %s5977_s10  ;;  %p5981_p5 = scmp.lt.u32.totalorder %s5977_s10, %s6227_s2 }
  0x4b   :  { %p5983_p6 = pnand %p5981_p5, %p5978_p4 }
  0x4d   :  { %5986 = shalt.err (!%p5983_p6)
}
  0x4e   :  { %s5987_s0 = scalar_lea.vmem %s46_s27, 64  ;;  %p5992_p8 = scmp.lt.s32.totalorder %s46_s27, %s46_s27 }
  0x4f   :  { %p5988_p7 = scmp.ne.s32.totalorder %s46_s27, %s5987_s0  ;;  %p5993_p9 = scmp.lt.s32.totalorder %s5987_s0, %s5987_s0 }
  0x51   :  { %p5994_p10 = por %p5993_p9, %p5992_p8 }
  0x53   :  { %p5995_p11 = pnand %p5994_p10, %p5988_p7 }
  0x55   :  { %5998 = shalt.err (!%p5995_p11)
}
  0x56   :  { %48 = dma.hbm_to_vmem [thread:$0]  %s6227_s2, 64, %s46_s27, [#allocation6]  }
  0x57   :  { %s5999_s17 = scalar_lea.hbm %s6229_s4, 16 }
  0x58   :  { %p6000_p12 = scmp.ne.s32.totalorder %s6229_s4, %s5999_s17  ;;  %p6003_p13 = scmp.lt.u32.totalorder %s5999_s17, %s6229_s4 }
  0x5a   :  { %p6005_p0 = pnand %p6003_p13, %p6000_p12 }
  0x5c   :  { %6008 = shalt.err (!%p6005_p0)
}
  0x5d   :  { %s6009_s22 = scalar_lea.vmem %s68_s29, 16  ;;  %s6013_s23 = scalar_lea.vmem %s68_s29, 32 }
  0x5e   :  { %p6010_p1 = scmp.ne.s32.totalorder %s68_s29, %s6009_s22  ;;  %p6014_p2 = scmp.lt.s32.totalorder %s68_s29, %s68_s29 }
  0x5f   :  { %p6015_p3 = scmp.lt.s32.totalorder %s6013_s23, %s6009_s22 }
  0x61   :  { %p6016_p4 = por %p6015_p3, %p6014_p2 }
  0x63   :  { %p6017_p5 = pnand %p6016_p4, %p6010_p1 }
  0x65   :  { %6020 = shalt.err (!%p6017_p5)
}
  0x66   :  { %70 = dma.hbm_to_vmem [thread:$0]  %s6229_s4, 16, %s68_s29, [#allocation9]  }
  0x67   :  { %s6085_s26 = smov [#allocation13]   ;;  %s6021_s27 = scalar_lea.hbm %s6231_s6, 16 }
  0x68   :  { %s89_s5 = sshll.u32 %s6085_s26, 4  ;;  %p6022_p6 = scmp.ne.s32.totalorder %s6231_s6, %s6021_s27  ;;  %s90_s5 = int_to_ptr.vmem [resolvable:$true] %s89_s5 }
  0x69   :  { %p6025_p7 = scmp.lt.u32.totalorder %s6021_s27, %s6231_s6 }
  0x6b   :  { %p6027_p8 = pnand %p6025_p7, %p6022_p6 }
  0x6d   :  { %6030 = shalt.err (!%p6027_p8)
}
  0x6e   :  { %s6031_s11 = scalar_lea.vmem %s90_s5, 16  ;;  %s6035_s4 = scalar_lea.vmem %s90_s5, 32 }
  0x6f   :  { %p6032_p9 = scmp.ne.s32.totalorder %s90_s5, %s6031_s11  ;;  %p6036_p10 = scmp.lt.s32.totalorder %s90_s5, %s90_s5 }
  0x70   :  { %p6037_p11 = scmp.lt.s32.totalorder %s6035_s4, %s6031_s11 }
  0x72   :  { %p6038_p12 = por %p6037_p11, %p6036_p10 }
  0x74   :  { %p6039_p13 = pnand %p6038_p12, %p6032_p9 }
  0x76   :  { %6042 = shalt.err (!%p6039_p13)
}
  0x77   :  { %92 = dma.hbm_to_vmem [thread:$0]  %s6231_s6, 16, %s90_s5, [#allocation12]  }
  0x78   :  { %6065 = dma.done.wait [#allocation3], 2048  }
  0x79   :  { %6066 = vsyncadd [#allocation3], 4294965248 }
  0x7a   :  { %6067 = dma.done.wait [#allocation6], 65600  }
  0x7b   :  { %6068 = vsyncadd [#allocation6], 4294901696 }
  0x7c   :  { %6069 = dma.done.wait [#allocation9], 4112  }
  0x7d   :  { %6070 = vsyncadd [#allocation9], 4294963184 }
  0x7e   :  { %6071 = dma.done.wait [#allocation12], 1040  }
  0x7f   :  { %6072 = vsyncadd [#allocation12], 4294966256  ;;  %v5081_v0 = vld [vmem:[#allocation5 + $0x4] ss:$16 sps:$4 sm:$0xff]   ;;  %v5083_v1 = vld [vmem:[#allocation5 + $0xc] ss:$16 sps:$4 sm:$0xff]  }
  0x80   :  { %3241 = vmatprep.subr.bf16.mxu0 %v5081_v0  ;;  %v5085_v2 = vld [vmem:[#allocation5] ss:$16 sps:$4 sm:$0xff]   ;;  %v5086_v3 = vld [vmem:[#allocation5 + $0x8] ss:$16 sps:$4 sm:$0xff]   ;;  %3569 = vmatprep.subr.bf16.mxu1 %v5083_v1  ;;  %v5087_v4 = vld [vmem:[#allocation5 + $0x24] ss:$16 sps:$4 sm:$0xff]  }
  0x81   :  { %3242 = vmatpush1.bf16.msra.mxu0 %v5085_v2  ;;  %3570 = vmatpush1.bf16.msra.mxu1 %v5086_v3  ;;  %v5089_v5 = vld [vmem:[#allocation5 + $0x2c] ss:$16 sps:$4 sm:$0xff]   ;;  %v5091_v6 = vld [vmem:[#allocation5 + $0x20] ss:$16 sps:$4 sm:$0xff]   ;;  %v5092_v7 = vld [vmem:[#allocation5 + $0x28] ss:$16 sps:$4 sm:$0xff]  }
  0x82   :  { %3243 = vmatprep.subr.bf16.mxu0 %v5087_v4  ;;  %3571 = vmatprep.subr.bf16.mxu1 %v5089_v5  ;;  %v5093_v8 = vld [vmem:[#allocation5 + $0x44] ss:$16 sps:$4 sm:$0xff]   ;;  %v5095_v9 = vld [vmem:[#allocation5 + $0x4c] ss:$16 sps:$4 sm:$0xff]   ;;  %v5097_v10 = vld [vmem:[#allocation5 + $0x40] ss:$16 sps:$4 sm:$0xff]  }
  0x83   :  { %v5098_v11 = vld [vmem:[#allocation5 + $0x48] ss:$16 sps:$4 sm:$0xff]   ;;  %v5099_v12 = vld [vmem:[#allocation5 + $0x64] ss:$16 sps:$4 sm:$0xff]   ;;  %v5101_v13 = vld [vmem:[#allocation5 + $0x6c] ss:$16 sps:$4 sm:$0xff]  }
  0x84   :  { %v5103_v14 = vld [vmem:[#allocation5 + $0x60] ss:$16 sps:$4 sm:$0xff]   ;;  %v5104_v15 = vld [vmem:[#allocation5 + $0x68] ss:$16 sps:$4 sm:$0xff]   ;;  %v5105_v16 = vld [vmem:[#allocation5 + $0x84] ss:$16 sps:$4 sm:$0xff]  }
  0x85   :  { %3244 = vmatpush1.bf16.msra.mxu0 %v5091_v6  ;;  %3572 = vmatpush1.bf16.msra.mxu1 %v5092_v7  ;;  %v5107_v17 = vld [vmem:[#allocation5 + $0x8c] ss:$16 sps:$4 sm:$0xff]   ;;  %v5109_v18 = vld [vmem:[#allocation5 + $0x80] ss:$16 sps:$4 sm:$0xff]   ;;  %v5110_v19 = vld [vmem:[#allocation5 + $0x88] ss:$16 sps:$4 sm:$0xff]  }
  0x86   :  { %3245 = vmatprep.subr.bf16.mxu0 %v5093_v8  ;;  %3573 = vmatprep.subr.bf16.mxu1 %v5095_v9  ;;  %v5111_v20 = vld [vmem:[#allocation5 + $0xa4] ss:$16 sps:$4 sm:$0xff]   ;;  %v5113_v21 = vld [vmem:[#allocation5 + $0xac] ss:$16 sps:$4 sm:$0xff]   ;;  %v5115_v22 = vld [vmem:[#allocation5 + $0xa0] ss:$16 sps:$4 sm:$0xff]  }
  0x87   :  { %v5116_v23 = vld [vmem:[#allocation5 + $0xa8] ss:$16 sps:$4 sm:$0xff]   ;;  %v5117_v24 = vld [vmem:[#allocation5 + $0xc4] ss:$16 sps:$4 sm:$0xff]   ;;  %v5119_v25 = vld [vmem:[#allocation5 + $0xcc] ss:$16 sps:$4 sm:$0xff]  }
  0x88   :  { %v5121_v26 = vld [vmem:[#allocation5 + $0xc0] ss:$16 sps:$4 sm:$0xff]   ;;  %v5122_v27 = vld [vmem:[#allocation5 + $0xc8] ss:$16 sps:$4 sm:$0xff]   ;;  %v5123_v28 = vld [vmem:[#allocation5 + $0xe4] ss:$16 sps:$4 sm:$0xff]  }
  0x89   :  { %3246 = vmatpush1.bf16.msra.mxu0 %v5097_v10  ;;  %3574 = vmatpush1.bf16.msra.mxu1 %v5098_v11  ;;  %v5125_v29 = vld [vmem:[#allocation5 + $0xec] ss:$16 sps:$4 sm:$0xff]   ;;  %v5127_v30 = vld [vmem:[#allocation5 + $0xe0] ss:$16 sps:$4 sm:$0xff]   ;;  %v5128_v31 = vld [vmem:[#allocation5 + $0xe8] ss:$16 sps:$4 sm:$0xff]  }
  0x8a   :  { %3247 = vmatprep.subr.bf16.mxu0 %v5099_v12  ;;  %3575 = vmatprep.subr.bf16.mxu1 %v5101_v13  ;;  %v5129_v32 = vld [vmem:[#allocation5 + $0x104] ss:$16 sps:$4 sm:$0xff]   ;;  %v5131_v33 = vld [vmem:[#allocation5 + $0x10c] ss:$16 sps:$4 sm:$0xff]   ;;  %v5133_v34 = vld [vmem:[#allocation5 + $0x100] ss:$16 sps:$4 sm:$0xff]  }
  0x8b   :  { %v5134_v35 = vld [vmem:[#allocation5 + $0x108] ss:$16 sps:$4 sm:$0xff]   ;;  %v5135_v36 = vld [vmem:[#allocation5 + $0x124] ss:$16 sps:$4 sm:$0xff]   ;;  %v5137_v37 = vld [vmem:[#allocation5 + $0x12c] ss:$16 sps:$4 sm:$0xff]  }
  0x8c   :  { %v5139_v38 = vld [vmem:[#allocation5 + $0x120] ss:$16 sps:$4 sm:$0xff]   ;;  %v5140_v39 = vld [vmem:[#allocation5 + $0x128] ss:$16 sps:$4 sm:$0xff]   ;;  %v5141_v40 = vld [vmem:[#allocation5 + $0x144] ss:$16 sps:$4 sm:$0xff]  }
  0x8d   :  { %3248 = vmatpush1.bf16.msra.mxu0 %v5103_v14  ;;  %3576 = vmatpush1.bf16.msra.mxu1 %v5104_v15  ;;  %v5143_v41 = vld [vmem:[#allocation5 + $0x14c] ss:$16 sps:$4 sm:$0xff]   ;;  %v5145_v42 = vld [vmem:[#allocation5 + $0x140] ss:$16 sps:$4 sm:$0xff]   ;;  %v5146_v43 = vld [vmem:[#allocation5 + $0x148] ss:$16 sps:$4 sm:$0xff]  }
  0x8e   :  { %3249 = vmatprep.subr.bf16.mxu0 %v5105_v16  ;;  %3577 = vmatprep.subr.bf16.mxu1 %v5107_v17  ;;  %v5147_v44 = vld [vmem:[#allocation5 + $0x164] ss:$16 sps:$4 sm:$0xff]   ;;  %v5149_v45 = vld [vmem:[#allocation5 + $0x16c] ss:$16 sps:$4 sm:$0xff]   ;;  %v5151_v47 = vld [vmem:[#allocation5 + $0x160] ss:$16 sps:$4 sm:$0xff]  }
  0x8f   :  { %v116_v46 = vld [vmem:[#allocation2 + $0x8] sm:$0xff]  ;;  %v5153_v50 = vld [vmem:[#allocation5 + $0x184] ss:$16 sps:$4 sm:$0xff]   ;;  %v5157_v52 = vld [vmem:[#allocation5 + $0x180] ss:$16 sps:$4 sm:$0xff]   ;;  %vm6087_vm0 = vmmov 0  }
  0x90   :  { %v132_v48 = vpack.c.bf16 %v116_v46, %v116_v46  ;;  %v5152_v49 = vld [vmem:[#allocation5 + $0x168] ss:$16 sps:$4 sm:$0xff]   ;;  %v5155_v51 = vld [vmem:[#allocation5 + $0x18c] ss:$16 sps:$4 sm:$0xff]   ;;  %v5159_v54 = vld [vmem:[#allocation5 + $0x1a4] ss:$16 sps:$4 sm:$0xff]  }
  0x91   :  { %3250 = vmatpush1.bf16.msra.mxu0 %v5109_v18  ;;  %3578 = vmatpush1.bf16.msra.mxu1 %v5110_v19  ;;  %v5158_v53 = vld [vmem:[#allocation5 + $0x188] ss:$16 sps:$4 sm:$0xff]   ;;  %v5161_v55 = vld [vmem:[#allocation5 + $0x1ac] ss:$16 sps:$4 sm:$0xff]   ;;  %v5163_v56 = vld [vmem:[#allocation5 + $0x1a0] ss:$16 sps:$4 sm:$0xff]  }
  0x92   :  { %3251 = vmatprep.subr.bf16.mxu0 %v5111_v20  ;;  %3579 = vmatprep.subr.bf16.mxu1 %v5113_v21  ;;  %v5164_v57 = vld [vmem:[#allocation5 + $0x1a8] ss:$16 sps:$4 sm:$0xff]   ;;  %v5165_v58 = vld [vmem:[#allocation5 + $0x1c4] ss:$16 sps:$4 sm:$0xff]   ;;  %v5167_v59 = vld [vmem:[#allocation5 + $0x1cc] ss:$16 sps:$4 sm:$0xff]  }
  0x93   :  { %3273 = vmatprep.mubr.bf16.mxu0 %v132_v48  ;;  %3601 = vmatprep.mubr.bf16.mxu1 %v132_v48  ;;  %v5169_v60 = vld [vmem:[#allocation5 + $0x1c0] ss:$16 sps:$4 sm:$0xff]   ;;  %v5170_v61 = vld [vmem:[#allocation5 + $0x1c8] ss:$16 sps:$4 sm:$0xff]   ;;  %v5171_v62 = vld [vmem:[#allocation5 + $0x1e4] ss:$16 sps:$4 sm:$0xff]  }
  0x94   :  { %v5173_v63 = vld [vmem:[#allocation5 + $0x1ec] ss:$16 sps:$4 sm:$0xff]   ;;  %v5175_v0 = vld [vmem:[#allocation5 + $0x1e0] ss:$16 sps:$4 sm:$0xff]   ;;  %v5176_v1 = vld [vmem:[#allocation5 + $0x1e8] ss:$16 sps:$4 sm:$0xff]  }
  0x95   :  { %3252 = vmatpush1.bf16.msra.mxu0 %v5115_v22  ;;  %3580 = vmatpush1.bf16.msra.mxu1 %v5116_v23  ;;  %v115_v2 = vld [vmem:[#allocation2] sm:$0xff]  ;;  %v5182_v4 = vld [vmem:[#allocation5 + $0x20c] ss:$16 sps:$4 sm:$0xff]   ;;  %v5180_v7 = vld [vmem:[#allocation5 + $0x208] ss:$16 sps:$4 sm:$0xff]   ;;  %s6088_s6 = smov [#allocation14]  }
  0x96   :  { %3253 = vmatprep.subr.bf16.mxu0 %v5117_v24  ;;  %3581 = vmatprep.subr.bf16.mxu1 %v5119_v25  ;;  %v5179_v3 = vld [vmem:[#allocation5 + $0x204] ss:$16 sps:$4 sm:$0xff]   ;;  %v131_v5 = vpack.c.bf16 %v115_v2, %v115_v2  ;;  %v5177_v6 = vld [vmem:[#allocation5 + $0x200] ss:$16 sps:$4 sm:$0xff]   ;;  %v5188_v9 = vld [vmem:[#allocation5 + $0x22c] ss:$16 sps:$4 sm:$0xff]  }
  0x97   :  { %v5185_v8 = vld [vmem:[#allocation5 + $0x224] ss:$16 sps:$4 sm:$0xff]   ;;  %v5183_v10 = vld [vmem:[#allocation5 + $0x220] ss:$16 sps:$4 sm:$0xff]   ;;  %v5186_v11 = vld [vmem:[#allocation5 + $0x228] ss:$16 sps:$4 sm:$0xff]  }
  0x98   :  { %v5191_v12 = vld [vmem:[#allocation5 + $0x244] ss:$16 sps:$4 sm:$0xff]   ;;  %v5194_v13 = vld [vmem:[#allocation5 + $0x24c] ss:$16 sps:$4 sm:$0xff]   ;;  %v5189_v14 = vld [vmem:[#allocation5 + $0x240] ss:$16 sps:$4 sm:$0xff]  }
  0x99   :  { %3254 = vmatpush1.bf16.msra.mxu0 %v5121_v26  ;;  %3582 = vmatpush1.bf16.msra.mxu1 %v5122_v27  ;;  %v5192_v15 = vld [vmem:[#allocation5 + $0x248] ss:$16 sps:$4 sm:$0xff]   ;;  %v5197_v16 = vld [vmem:[#allocation5 + $0x264] ss:$16 sps:$4 sm:$0xff]   ;;  %v5200_v17 = vld [vmem:[#allocation5 + $0x26c] ss:$16 sps:$4 sm:$0xff]  }
  0x9a   :  { %3255 = vmatprep.subr.bf16.mxu0 %v5123_v28  ;;  %3583 = vmatprep.subr.bf16.mxu1 %v5125_v29  ;;  %v5195_v18 = vld [vmem:[#allocation5 + $0x260] ss:$16 sps:$4 sm:$0xff]   ;;  %v5198_v19 = vld [vmem:[#allocation5 + $0x268] ss:$16 sps:$4 sm:$0xff]   ;;  %v5203_v20 = vld [vmem:[#allocation5 + $0x284] ss:$16 sps:$4 sm:$0xff]  }
  0x9b   :  { %v5206_v21 = vld [vmem:[#allocation5 + $0x28c] ss:$16 sps:$4 sm:$0xff]   ;;  %v5201_v22 = vld [vmem:[#allocation5 + $0x280] ss:$16 sps:$4 sm:$0xff]   ;;  %v5204_v23 = vld [vmem:[#allocation5 + $0x288] ss:$16 sps:$4 sm:$0xff]  }
  0x9c   :  { %v5209_v24 = vld [vmem:[#allocation5 + $0x2a4] ss:$16 sps:$4 sm:$0xff]   ;;  %v5212_v25 = vld [vmem:[#allocation5 + $0x2ac] ss:$16 sps:$4 sm:$0xff]   ;;  %v5207_v26 = vld [vmem:[#allocation5 + $0x2a0] ss:$16 sps:$4 sm:$0xff]  }
  0x9d   :  { %3256 = vmatpush1.bf16.msra.mxu0 %v5127_v30  ;;  %3584 = vmatpush1.bf16.msra.mxu1 %v5128_v31  ;;  %v5210_v27 = vld [vmem:[#allocation5 + $0x2a8] ss:$16 sps:$4 sm:$0xff]   ;;  %v5215_v28 = vld [vmem:[#allocation5 + $0x2c4] ss:$16 sps:$4 sm:$0xff]   ;;  %v5218_v29 = vld [vmem:[#allocation5 + $0x2cc] ss:$16 sps:$4 sm:$0xff]  }
  0x9e   :  { %3257 = vmatprep.subr.bf16.mxu0 %v5129_v32  ;;  %3585 = vmatprep.subr.bf16.mxu1 %v5131_v33  ;;  %v118_v30 = vld [vmem:[#allocation2 + $0x18] sm:$0xff]  ;;  %v5213_v31 = vld [vmem:[#allocation5 + $0x2c0] ss:$16 sps:$4 sm:$0xff]   ;;  %v5239_v46 = vld [vmem:[#allocation5 + $0x344] ss:$16 sps:$4 sm:$0xff]   ;;  %s4368_s13 = sshll.u32 %s6088_s6, 4  ;;  %s4369_s13 = int_to_ptr.vmem [resolvable:$true] %s4368_s13 }
  0x9f   :  { %v134_v32 = vpack.c.bf16 %v118_v30, %v118_v30  ;;  %v5216_v33 = vld [vmem:[#allocation5 + $0x2c8] ss:$16 sps:$4 sm:$0xff]   ;;  %v5237_v48 = vld [vmem:[#allocation5 + $0x340] ss:$16 sps:$4 sm:$0xff]   ;;  %v5269_v2 = vld [vmem:[#allocation5 + $0x3e4] ss:$16 sps:$4 sm:$0xff]   ;;  %p6048_p1 = scmp.lt.s32.totalorder %s4369_s13, %s4369_s13 }
  0xa0   :  { %v5305_v30 = vld [vmem:[#allocation5 + $0x4a4] ss:$16 sps:$4 sm:$0xff]   ;;  %s6043_s14 = scalar_lea.vmem %s4369_s13, 128 }
  0xa1   :  { %3258 = vmatpush1.bf16.msra.mxu0 %v5133_v34  ;;  %3586 = vmatpush1.bf16.msra.mxu1 %v5134_v35  ;;  %v5221_v34 = vld [vmem:[#allocation5 + $0x2e4] ss:$16 sps:$4 sm:$0xff]   ;;  %v5224_v35 = vld [vmem:[#allocation5 + $0x2ec] ss:$16 sps:$4 sm:$0xff]   ;;  %p6044_p0 = scmp.ne.s32.totalorder %s4369_s13, %s6043_s14  ;;  %p6049_p2 = scmp.lt.s32.totalorder %s6043_s14, %s6043_s14 }
  0xa2   :  { %3259 = vmatprep.subr.bf16.mxu0 %v5135_v36  ;;  %3587 = vmatprep.subr.bf16.mxu1 %v5137_v37  ;;  %v5219_v36 = vld [vmem:[#allocation5 + $0x2e0] ss:$16 sps:$4 sm:$0xff]   ;;  %v5222_v37 = vld [vmem:[#allocation5 + $0x2e8] ss:$16 sps:$4 sm:$0xff]  }
  0xa3   :  { %p6050_p3 = por %p6049_p2, %p6048_p1 }
  0xa5   :  { %3260 = vmatpush1.bf16.msra.mxu0 %v5139_v38  ;;  %3588 = vmatpush1.bf16.msra.mxu1 %v5140_v39  ;;  %v5227_v38 = vld [vmem:[#allocation5 + $0x304] ss:$16 sps:$4 sm:$0xff]   ;;  %v5230_v39 = vld [vmem:[#allocation5 + $0x30c] ss:$16 sps:$4 sm:$0xff]   ;;  %p6051_p4 = pnand %p6050_p3, %p6044_p0 }
  0xa6   :  { %3261 = vmatprep.subr.bf16.mxu0 %v5141_v40  ;;  %3589 = vmatprep.subr.bf16.mxu1 %v5143_v41  ;;  %v5225_v40 = vld [vmem:[#allocation5 + $0x300] ss:$16 sps:$4 sm:$0xff]   ;;  %v5228_v41 = vld [vmem:[#allocation5 + $0x308] ss:$16 sps:$4 sm:$0xff]  }
  0xa9   :  { %3262 = vmatpush1.bf16.msra.mxu0 %v5145_v42  ;;  %3590 = vmatpush1.bf16.msra.mxu1 %v5146_v43  ;;  %v5233_v42 = vld [vmem:[#allocation5 + $0x324] ss:$16 sps:$4 sm:$0xff]   ;;  %v5236_v43 = vld [vmem:[#allocation5 + $0x32c] ss:$16 sps:$4 sm:$0xff]  }
  0xaa   :  { %3263 = vmatprep.subr.bf16.mxu0 %v5147_v44  ;;  %3591 = vmatprep.subr.bf16.mxu1 %v5149_v45  ;;  %v5231_v44 = vld [vmem:[#allocation5 + $0x320] ss:$16 sps:$4 sm:$0xff]   ;;  %v5234_v45 = vld [vmem:[#allocation5 + $0x328] ss:$16 sps:$4 sm:$0xff]  }
  0xad   :  { %3264 = vmatpush1.bf16.msra.mxu0 %v5151_v47  ;;  %3592 = vmatpush1.bf16.msra.mxu1 %v5152_v49  ;;  %v5242_v47 = vld [vmem:[#allocation5 + $0x34c] ss:$16 sps:$4 sm:$0xff]   ;;  %v5240_v49 = vld [vmem:[#allocation5 + $0x348] ss:$16 sps:$4 sm:$0xff]  }
  0xae   :  { %3265 = vmatprep.subr.bf16.mxu0 %v5153_v50  ;;  %3593 = vmatprep.subr.bf16.mxu1 %v5155_v51  ;;  %v5245_v50 = vld [vmem:[#allocation5 + $0x364] ss:$16 sps:$4 sm:$0xff]   ;;  %v5248_v51 = vld [vmem:[#allocation5 + $0x36c] ss:$16 sps:$4 sm:$0xff]  }
  0xb1   :  { %3266 = vmatpush1.bf16.msra.mxu0 %v5157_v52  ;;  %3594 = vmatpush1.bf16.msra.mxu1 %v5158_v53  ;;  %v5243_v52 = vld [vmem:[#allocation5 + $0x360] ss:$16 sps:$4 sm:$0xff]   ;;  %v5246_v53 = vld [vmem:[#allocation5 + $0x368] ss:$16 sps:$4 sm:$0xff]  }
  0xb2   :  { %3267 = vmatprep.subr.bf16.mxu0 %v5159_v54  ;;  %3595 = vmatprep.subr.bf16.mxu1 %v5161_v55  ;;  %v5251_v54 = vld [vmem:[#allocation5 + $0x384] ss:$16 sps:$4 sm:$0xff]   ;;  %v5254_v55 = vld [vmem:[#allocation5 + $0x38c] ss:$16 sps:$4 sm:$0xff]  }
  0xb5   :  { %3268 = vmatpush1.bf16.msra.mxu0 %v5163_v56  ;;  %3596 = vmatpush1.bf16.msra.mxu1 %v5164_v57  ;;  %v5249_v56 = vld [vmem:[#allocation5 + $0x380] ss:$16 sps:$4 sm:$0xff]   ;;  %v5252_v57 = vld [vmem:[#allocation5 + $0x388] ss:$16 sps:$4 sm:$0xff]  }
  0xb6   :  { %3269 = vmatprep.subr.bf16.mxu0 %v5165_v58  ;;  %3597 = vmatprep.subr.bf16.mxu1 %v5167_v59  ;;  %v5257_v58 = vld [vmem:[#allocation5 + $0x3a4] ss:$16 sps:$4 sm:$0xff]   ;;  %v5260_v59 = vld [vmem:[#allocation5 + $0x3ac] ss:$16 sps:$4 sm:$0xff]  }
  0xb9   :  { %3270 = vmatpush1.bf16.msra.mxu0 %v5169_v60  ;;  %3598 = vmatpush1.bf16.msra.mxu1 %v5170_v61  ;;  %v5255_v60 = vld [vmem:[#allocation5 + $0x3a0] ss:$16 sps:$4 sm:$0xff]   ;;  %v5258_v61 = vld [vmem:[#allocation5 + $0x3a8] ss:$16 sps:$4 sm:$0xff]  }
  0xba   :  { %3271 = vmatprep.subr.bf16.mxu0 %v5171_v62  ;;  %3599 = vmatprep.subr.bf16.mxu1 %v5173_v63  ;;  %v5263_v62 = vld [vmem:[#allocation5 + $0x3c4] ss:$16 sps:$4 sm:$0xff]   ;;  %v5266_v63 = vld [vmem:[#allocation5 + $0x3cc] ss:$16 sps:$4 sm:$0xff]  }
  0xbd   :  { %3272 = vmatpush1.bf16.msra.mxu0 %v5175_v0  ;;  %3600 = vmatpush1.bf16.msra.mxu1 %v5176_v1  ;;  %v5261_v0 = vld [vmem:[#allocation5 + $0x3c0] ss:$16 sps:$4 sm:$0xff]   ;;  %v5264_v1 = vld [vmem:[#allocation5 + $0x3c8] ss:$16 sps:$4 sm:$0xff]  }
  0xbe   :  { %3282 = vmatprep.subr.bf16.mxu0 %v5179_v3  ;;  %3610 = vmatprep.subr.bf16.mxu1 %v5182_v4  ;;  %v5272_v3 = vld [vmem:[#allocation5 + $0x3ec] ss:$16 sps:$4 sm:$0xff]   ;;  %v5267_v4 = vld [vmem:[#allocation5 + $0x3e0] ss:$16 sps:$4 sm:$0xff]  }
  0xc0   :  { %3274 = vmatmul.mubr.bf16.vlgmr.msra.gmra.mrb[0].mxu0 %v131_v5  ;;  %3602 = vmatmul.mubr.bf16.vlgmr.msra.gmra.mrb[0].mxu1 %v131_v5  ;;  %v5270_v5 = vld [vmem:[#allocation5 + $0x3e8] ss:$16 sps:$4 sm:$0xff]  }
  0xc1   :  { %3283 = vmatpush1.bf16.msra.mxu0 %v5177_v6  ;;  %3611 = vmatpush1.bf16.msra.mxu1 %v5180_v7  ;;  %v5275_v6 = vld [vmem:[#allocation5 + $0x404] ss:$16 sps:$4 sm:$0xff]  }
  0xc2   :  { %3284 = vmatprep.subr.bf16.mxu0 %v5185_v8  ;;  %3612 = vmatprep.subr.bf16.mxu1 %v5188_v9  ;;  %v117_v7 = vld [vmem:[#allocation2 + $0x10] sm:$0xff]  ;;  %v5278_v8 = vld [vmem:[#allocation5 + $0x40c] ss:$16 sps:$4 sm:$0xff]  }
  0xc3   :  { %3314 = vmatprep.mubr.bf16.mxu0 %v134_v32  ;;  %3642 = vmatprep.mubr.bf16.mxu1 %v134_v32  ;;  %v5273_v9 = vld [vmem:[#allocation5 + $0x400] ss:$16 sps:$4 sm:$0xff]  }
  0xc4   :  { %v5303_v32 = vld [vmem:[#allocation5 + $0x4a0] ss:$16 sps:$4 sm:$0xff]  }
  0xc5   :  { %3285 = vmatpush1.bf16.msra.mxu0 %v5183_v10  ;;  %3613 = vmatpush1.bf16.msra.mxu1 %v5186_v11  ;;  %v5276_v10 = vld [vmem:[#allocation5 + $0x408] ss:$16 sps:$4 sm:$0xff]   ;;  %v133_v11 = vpack.c.bf16 %v117_v7, %v117_v7  ;;  %v5368_v7 = vld [vmem:[#allocation5 + $0x5ec] ss:$16 sps:$4 sm:$0xff]  }
  0xc6   :  { %3286 = vmatprep.subr.bf16.mxu0 %v5191_v12  ;;  %3614 = vmatprep.subr.bf16.mxu1 %v5194_v13  ;;  %v5281_v12 = vld [vmem:[#allocation5 + $0x424] ss:$16 sps:$4 sm:$0xff]   ;;  %v5284_v13 = vld [vmem:[#allocation5 + $0x42c] ss:$16 sps:$4 sm:$0xff]  }
  0xc9   :  { %3287 = vmatpush1.bf16.msra.mxu0 %v5189_v14  ;;  %3615 = vmatpush1.bf16.msra.mxu1 %v5192_v15  ;;  %v120_v14 = vld [vmem:[#allocation2 + $0x28] sm:$0xff] }
  0xca   :  { %3288 = vmatprep.subr.bf16.mxu0 %v5197_v16  ;;  %3616 = vmatprep.subr.bf16.mxu1 %v5200_v17  ;;  %v136_v15 = vpack.c.bf16 %v120_v14, %v120_v14  ;;  %v5279_v16 = vld [vmem:[#allocation5 + $0x420] ss:$16 sps:$4 sm:$0xff]   ;;  %v5282_v17 = vld [vmem:[#allocation5 + $0x428] ss:$16 sps:$4 sm:$0xff]  }
  0xcb   :  { %v5372_v14 = vld [vmem:[#allocation5 + $0x608] ss:$16 sps:$4 sm:$0xff]  }
  0xcd   :  { %3289 = vmatpush1.bf16.msra.mxu0 %v5195_v18  ;;  %3617 = vmatpush1.bf16.msra.mxu1 %v5198_v19  ;;  %v5287_v18 = vld [vmem:[#allocation5 + $0x444] ss:$16 sps:$4 sm:$0xff]   ;;  %v5290_v19 = vld [vmem:[#allocation5 + $0x44c] ss:$16 sps:$4 sm:$0xff]  }
  0xce   :  { %3290 = vmatprep.subr.bf16.mxu0 %v5203_v20  ;;  %3618 = vmatprep.subr.bf16.mxu1 %v5206_v21  ;;  %v5285_v20 = vld [vmem:[#allocation5 + $0x440] ss:$16 sps:$4 sm:$0xff]   ;;  %v5288_v21 = vld [vmem:[#allocation5 + $0x448] ss:$16 sps:$4 sm:$0xff]  }
  0xd1   :  { %3291 = vmatpush1.bf16.msra.mxu0 %v5201_v22  ;;  %3619 = vmatpush1.bf16.msra.mxu1 %v5204_v23  ;;  %v5293_v22 = vld [vmem:[#allocation5 + $0x464] ss:$16 sps:$4 sm:$0xff]   ;;  %v5296_v23 = vld [vmem:[#allocation5 + $0x46c] ss:$16 sps:$4 sm:$0xff]  }
  0xd2   :  { %3292 = vmatprep.subr.bf16.mxu0 %v5209_v24  ;;  %3620 = vmatprep.subr.bf16.mxu1 %v5212_v25  ;;  %v5291_v24 = vld [vmem:[#allocation5 + $0x460] ss:$16 sps:$4 sm:$0xff]   ;;  %v5294_v25 = vld [vmem:[#allocation5 + $0x468] ss:$16 sps:$4 sm:$0xff]  }
  0xd5   :  { %3293 = vmatpush1.bf16.msra.mxu0 %v5207_v26  ;;  %3621 = vmatpush1.bf16.msra.mxu1 %v5210_v27  ;;  %v5299_v26 = vld [vmem:[#allocation5 + $0x484] ss:$16 sps:$4 sm:$0xff]   ;;  %v5302_v27 = vld [vmem:[#allocation5 + $0x48c] ss:$16 sps:$4 sm:$0xff]  }
  0xd6   :  { %3294 = vmatprep.subr.bf16.mxu0 %v5215_v28  ;;  %3622 = vmatprep.subr.bf16.mxu1 %v5218_v29  ;;  %v5297_v28 = vld [vmem:[#allocation5 + $0x480] ss:$16 sps:$4 sm:$0xff]   ;;  %v5300_v29 = vld [vmem:[#allocation5 + $0x488] ss:$16 sps:$4 sm:$0xff]  }
  0xd9   :  { %3295 = vmatpush1.bf16.msra.mxu0 %v5213_v31  ;;  %3623 = vmatpush1.bf16.msra.mxu1 %v5216_v33  ;;  %v5308_v31 = vld [vmem:[#allocation5 + $0x4ac] ss:$16 sps:$4 sm:$0xff]   ;;  %v5306_v33 = vld [vmem:[#allocation5 + $0x4a8] ss:$16 sps:$4 sm:$0xff]  }
  0xda   :  { %3296 = vmatprep.subr.bf16.mxu0 %v5221_v34  ;;  %3624 = vmatprep.subr.bf16.mxu1 %v5224_v35  ;;  %v5311_v34 = vld [vmem:[#allocation5 + $0x4c4] ss:$16 sps:$4 sm:$0xff]   ;;  %v5314_v35 = vld [vmem:[#allocation5 + $0x4cc] ss:$16 sps:$4 sm:$0xff]  }
  0xdd   :  { %3297 = vmatpush1.bf16.msra.mxu0 %v5219_v36  ;;  %3625 = vmatpush1.bf16.msra.mxu1 %v5222_v37  ;;  %v5309_v36 = vld [vmem:[#allocation5 + $0x4c0] ss:$16 sps:$4 sm:$0xff]   ;;  %v5312_v37 = vld [vmem:[#allocation5 + $0x4c8] ss:$16 sps:$4 sm:$0xff]  }
  0xde   :  { %3298 = vmatprep.subr.bf16.mxu0 %v5227_v38  ;;  %3626 = vmatprep.subr.bf16.mxu1 %v5230_v39  ;;  %v5317_v38 = vld [vmem:[#allocation5 + $0x4e4] ss:$16 sps:$4 sm:$0xff]   ;;  %v5320_v39 = vld [vmem:[#allocation5 + $0x4ec] ss:$16 sps:$4 sm:$0xff]  }
  0xe1   :  { %3299 = vmatpush1.bf16.msra.mxu0 %v5225_v40  ;;  %3627 = vmatpush1.bf16.msra.mxu1 %v5228_v41  ;;  %v5315_v40 = vld [vmem:[#allocation5 + $0x4e0] ss:$16 sps:$4 sm:$0xff]   ;;  %v5318_v41 = vld [vmem:[#allocation5 + $0x4e8] ss:$16 sps:$4 sm:$0xff]  }
  0xe2   :  { %3300 = vmatprep.subr.bf16.mxu0 %v5233_v42  ;;  %3628 = vmatprep.subr.bf16.mxu1 %v5236_v43  ;;  %v5323_v42 = vld [vmem:[#allocation5 + $0x504] ss:$16 sps:$4 sm:$0xff]   ;;  %v5326_v43 = vld [vmem:[#allocation5 + $0x50c] ss:$16 sps:$4 sm:$0xff]  }
  0xe5   :  { %3301 = vmatpush1.bf16.msra.mxu0 %v5231_v44  ;;  %3629 = vmatpush1.bf16.msra.mxu1 %v5234_v45  ;;  %v5321_v44 = vld [vmem:[#allocation5 + $0x500] ss:$16 sps:$4 sm:$0xff]   ;;  %v5324_v45 = vld [vmem:[#allocation5 + $0x508] ss:$16 sps:$4 sm:$0xff]  }
  0xe6   :  { %3302 = vmatprep.subr.bf16.mxu0 %v5239_v46  ;;  %3630 = vmatprep.subr.bf16.mxu1 %v5242_v47  ;;  %v5329_v46 = vld [vmem:[#allocation5 + $0x524] ss:$16 sps:$4 sm:$0xff]   ;;  %v5332_v47 = vld [vmem:[#allocation5 + $0x52c] ss:$16 sps:$4 sm:$0xff]  }
  0xe9   :  { %3303 = vmatpush1.bf16.msra.mxu0 %v5237_v48  ;;  %3631 = vmatpush1.bf16.msra.mxu1 %v5240_v49  ;;  %v5327_v48 = vld [vmem:[#allocation5 + $0x520] ss:$16 sps:$4 sm:$0xff]   ;;  %v5330_v49 = vld [vmem:[#allocation5 + $0x528] ss:$16 sps:$4 sm:$0xff]  }
  0xea   :  { %3304 = vmatprep.subr.bf16.mxu0 %v5245_v50  ;;  %3632 = vmatprep.subr.bf16.mxu1 %v5248_v51  ;;  %v5335_v50 = vld [vmem:[#allocation5 + $0x544] ss:$16 sps:$4 sm:$0xff]   ;;  %v5338_v51 = vld [vmem:[#allocation5 + $0x54c] ss:$16 sps:$4 sm:$0xff]  }
  0xed   :  { %3305 = vmatpush1.bf16.msra.mxu0 %v5243_v52  ;;  %3633 = vmatpush1.bf16.msra.mxu1 %v5246_v53  ;;  %v5333_v52 = vld [vmem:[#allocation5 + $0x540] ss:$16 sps:$4 sm:$0xff]   ;;  %v5336_v53 = vld [vmem:[#allocation5 + $0x548] ss:$16 sps:$4 sm:$0xff]  }
  0xee   :  { %3306 = vmatprep.subr.bf16.mxu0 %v5251_v54  ;;  %3634 = vmatprep.subr.bf16.mxu1 %v5254_v55  ;;  %v5341_v54 = vld [vmem:[#allocation5 + $0x564] ss:$16 sps:$4 sm:$0xff]   ;;  %v5344_v55 = vld [vmem:[#allocation5 + $0x56c] ss:$16 sps:$4 sm:$0xff]  }
  0xf1   :  { %3307 = vmatpush1.bf16.msra.mxu0 %v5249_v56  ;;  %3635 = vmatpush1.bf16.msra.mxu1 %v5252_v57  ;;  %v5339_v56 = vld [vmem:[#allocation5 + $0x560] ss:$16 sps:$4 sm:$0xff]   ;;  %v5342_v57 = vld [vmem:[#allocation5 + $0x568] ss:$16 sps:$4 sm:$0xff]  }
  0xf2   :  { %3308 = vmatprep.subr.bf16.mxu0 %v5257_v58  ;;  %3636 = vmatprep.subr.bf16.mxu1 %v5260_v59  ;;  %v5347_v58 = vld [vmem:[#allocation5 + $0x584] ss:$16 sps:$4 sm:$0xff]   ;;  %v5350_v59 = vld [vmem:[#allocation5 + $0x58c] ss:$16 sps:$4 sm:$0xff]  }
  0xf5   :  { %3309 = vmatpush1.bf16.msra.mxu0 %v5255_v60  ;;  %3637 = vmatpush1.bf16.msra.mxu1 %v5258_v61  ;;  %v5345_v60 = vld [vmem:[#allocation5 + $0x580] ss:$16 sps:$4 sm:$0xff]   ;;  %v5348_v61 = vld [vmem:[#allocation5 + $0x588] ss:$16 sps:$4 sm:$0xff]  }
  0xf6   :  { %3310 = vmatprep.subr.bf16.mxu0 %v5263_v62  ;;  %3638 = vmatprep.subr.bf16.mxu1 %v5266_v63  ;;  %v5353_v62 = vld [vmem:[#allocation5 + $0x5a4] ss:$16 sps:$4 sm:$0xff]   ;;  %v5356_v63 = vld [vmem:[#allocation5 + $0x5ac] ss:$16 sps:$4 sm:$0xff]  }
  0xf9   :  { %3311 = vmatpush1.bf16.msra.mxu0 %v5261_v0  ;;  %3639 = vmatpush1.bf16.msra.mxu1 %v5264_v1  ;;  %v5351_v0 = vld [vmem:[#allocation5 + $0x5a0] ss:$16 sps:$4 sm:$0xff]   ;;  %v5354_v1 = vld [vmem:[#allocation5 + $0x5a8] ss:$16 sps:$4 sm:$0xff]  }
  0xfa   :  { %3312 = vmatprep.subr.bf16.mxu0 %v5269_v2  ;;  %3640 = vmatprep.subr.bf16.mxu1 %v5272_v3  ;;  %v5359_v2 = vld [vmem:[#allocation5 + $0x5c4] ss:$16 sps:$4 sm:$0xff]   ;;  %v5362_v3 = vld [vmem:[#allocation5 + $0x5cc] ss:$16 sps:$4 sm:$0xff]  }
  0xfd   :  { %3313 = vmatpush1.bf16.msra.mxu0 %v5267_v4  ;;  %3641 = vmatpush1.bf16.msra.mxu1 %v5270_v5  ;;  %v5357_v4 = vld [vmem:[#allocation5 + $0x5c0] ss:$16 sps:$4 sm:$0xff]   ;;  %v5360_v5 = vld [vmem:[#allocation5 + $0x5c8] ss:$16 sps:$4 sm:$0xff]  }
  0xfe   :  { %3323 = vmatprep.subr.bf16.mxu0 %v5275_v6  ;;  %3651 = vmatprep.subr.bf16.mxu1 %v5278_v8  ;;  %v5365_v6 = vld [vmem:[#allocation5 + $0x5e4] ss:$16 sps:$4 sm:$0xff]   ;;  %v5363_v8 = vld [vmem:[#allocation5 + $0x5e0] ss:$16 sps:$4 sm:$0xff]  }
 0x100   :  { %3315 = vmatmul.mubr.bf16.vlgmr.msra.gmra.mrb[0].mxu0 %v133_v11  ;;  %3643 = vmatmul.mubr.bf16.vlgmr.msra.gmra.mrb[0].mxu1 %v133_v11  ;;  %v119_v11 = vld [vmem:[#allocation2 + $0x20] sm:$0xff] }
 0x101   :  { %3324 = vmatpush1.bf16.msra.mxu0 %v5273_v9  ;;  %3652 = vmatpush1.bf16.msra.mxu1 %v5276_v10  ;;  %v5366_v9 = vld [vmem:[#allocation5 + $0x5e8] ss:$16 sps:$4 sm:$0xff]   ;;  %v5371_v10 = vld [vmem:[#allocation5 + $0x604] ss:$16 sps:$4 sm:$0xff]  }
 0x102   :  { %3325 = vmatprep.subr.bf16.mxu0 %v5281_v12  ;;  %3653 = vmatprep.subr.bf16.mxu1 %v5284_v13  ;;  %v5374_v12 = vld [vmem:[#allocation5 + $0x60c] ss:$16 sps:$4 sm:$0xff]   ;;  %v5369_v13 = vld [vmem:[#allocation5 + $0x600] ss:$16 sps:$4 sm:$0xff]  }
 0x103   :  { %3355 = vmatprep.mubr.bf16.mxu0 %v136_v15  ;;  %3683 = vmatprep.mubr.bf16.mxu1 %v136_v15  ;;  %v135_v15 = vpack.c.bf16 %v119_v11, %v119_v11  ;;  %v5464_v11 = vld [vmem:[#allocation5 + $0x7ec] ss:$16 sps:$4 sm:$0xff]  }
 0x105   :  { %3326 = vmatpush1.bf16.msra.mxu0 %v5279_v16  ;;  %3654 = vmatpush1.bf16.msra.mxu1 %v5282_v17  ;;  %v122_v16 = vld [vmem:[#allocation2 + $0x38] sm:$0xff]  ;;  %v5377_v17 = vld [vmem:[#allocation5 + $0x624] ss:$16 sps:$4 sm:$0xff]  }
 0x106   :  { %3327 = vmatprep.subr.bf16.mxu0 %v5287_v18  ;;  %3655 = vmatprep.subr.bf16.mxu1 %v5290_v19  ;;  %v5380_v18 = vld [vmem:[#allocation5 + $0x62c] ss:$16 sps:$4 sm:$0xff]   ;;  %v138_v19 = vpack.c.bf16 %v122_v16, %v122_v16 }
 0x107   :  { %v5470_v16 = vld [vmem:[#allocation5 + $0x80c] ss:$16 sps:$4 sm:$0xff]  }
 0x109   :  { %3328 = vmatpush1.bf16.msra.mxu0 %v5285_v20  ;;  %3656 = vmatpush1.bf16.msra.mxu1 %v5288_v21  ;;  %v5375_v20 = vld [vmem:[#allocation5 + $0x620] ss:$16 sps:$4 sm:$0xff]   ;;  %v5378_v21 = vld [vmem:[#allocation5 + $0x628] ss:$16 sps:$4 sm:$0xff]  }
 0x10a   :  { %3329 = vmatprep.subr.bf16.mxu0 %v5293_v22  ;;  %3657 = vmatprep.subr.bf16.mxu1 %v5296_v23  ;;  %v5383_v22 = vld [vmem:[#allocation5 + $0x644] ss:$16 sps:$4 sm:$0xff]   ;;  %v5386_v23 = vld [vmem:[#allocation5 + $0x64c] ss:$16 sps:$4 sm:$0xff]  }
 0x10d   :  { %3330 = vmatpush1.bf16.msra.mxu0 %v5291_v24  ;;  %3658 = vmatpush1.bf16.msra.mxu1 %v5294_v25  ;;  %v5381_v24 = vld [vmem:[#allocation5 + $0x640] ss:$16 sps:$4 sm:$0xff]   ;;  %v5384_v25 = vld [vmem:[#allocation5 + $0x648] ss:$16 sps:$4 sm:$0xff]  }
 0x10e   :  { %3331 = vmatprep.subr.bf16.mxu0 %v5299_v26  ;;  %3659 = vmatprep.subr.bf16.mxu1 %v5302_v27  ;;  %v5389_v26 = vld [vmem:[#allocation5 + $0x664] ss:$16 sps:$4 sm:$0xff]   ;;  %v5392_v27 = vld [vmem:[#allocation5 + $0x66c] ss:$16 sps:$4 sm:$0xff]  }
 0x111   :  { %3332 = vmatpush1.bf16.msra.mxu0 %v5297_v28  ;;  %3660 = vmatpush1.bf16.msra.mxu1 %v5300_v29  ;;  %v5387_v28 = vld [vmem:[#allocation5 + $0x660] ss:$16 sps:$4 sm:$0xff]   ;;  %v5390_v29 = vld [vmem:[#allocation5 + $0x668] ss:$16 sps:$4 sm:$0xff]  }
 0x112   :  { %3333 = vmatprep.subr.bf16.mxu0 %v5305_v30  ;;  %3661 = vmatprep.subr.bf16.mxu1 %v5308_v31  ;;  %v5395_v30 = vld [vmem:[#allocation5 + $0x684] ss:$16 sps:$4 sm:$0xff]   ;;  %v5398_v31 = vld [vmem:[#allocation5 + $0x68c] ss:$16 sps:$4 sm:$0xff]  }
 0x115   :  { %3334 = vmatpush1.bf16.msra.mxu0 %v5303_v32  ;;  %3662 = vmatpush1.bf16.msra.mxu1 %v5306_v33  ;;  %v5393_v32 = vld [vmem:[#allocation5 + $0x680] ss:$16 sps:$4 sm:$0xff]   ;;  %v5396_v33 = vld [vmem:[#allocation5 + $0x688] ss:$16 sps:$4 sm:$0xff]  }
 0x116   :  { %3335 = vmatprep.subr.bf16.mxu0 %v5311_v34  ;;  %3663 = vmatprep.subr.bf16.mxu1 %v5314_v35  ;;  %v5401_v34 = vld [vmem:[#allocation5 + $0x6a4] ss:$16 sps:$4 sm:$0xff]   ;;  %v5404_v35 = vld [vmem:[#allocation5 + $0x6ac] ss:$16 sps:$4 sm:$0xff]  }
 0x119   :  { %3336 = vmatpush1.bf16.msra.mxu0 %v5309_v36  ;;  %3664 = vmatpush1.bf16.msra.mxu1 %v5312_v37  ;;  %v5399_v36 = vld [vmem:[#allocation5 + $0x6a0] ss:$16 sps:$4 sm:$0xff]   ;;  %v5402_v37 = vld [vmem:[#allocation5 + $0x6a8] ss:$16 sps:$4 sm:$0xff]  }
 0x11a   :  { %3337 = vmatprep.subr.bf16.mxu0 %v5317_v38  ;;  %3665 = vmatprep.subr.bf16.mxu1 %v5320_v39  ;;  %v5407_v38 = vld [vmem:[#allocation5 + $0x6c4] ss:$16 sps:$4 sm:$0xff]   ;;  %v5410_v39 = vld [vmem:[#allocation5 + $0x6cc] ss:$16 sps:$4 sm:$0xff]  }
 0x11d   :  { %3338 = vmatpush1.bf16.msra.mxu0 %v5315_v40  ;;  %3666 = vmatpush1.bf16.msra.mxu1 %v5318_v41  ;;  %v5405_v40 = vld [vmem:[#allocation5 + $0x6c0] ss:$16 sps:$4 sm:$0xff]   ;;  %v5408_v41 = vld [vmem:[#allocation5 + $0x6c8] ss:$16 sps:$4 sm:$0xff]  }
 0x11e   :  { %3339 = vmatprep.subr.bf16.mxu0 %v5323_v42  ;;  %3667 = vmatprep.subr.bf16.mxu1 %v5326_v43  ;;  %v5413_v42 = vld [vmem:[#allocation5 + $0x6e4] ss:$16 sps:$4 sm:$0xff]   ;;  %v5416_v43 = vld [vmem:[#allocation5 + $0x6ec] ss:$16 sps:$4 sm:$0xff]  }
 0x121   :  { %3340 = vmatpush1.bf16.msra.mxu0 %v5321_v44  ;;  %3668 = vmatpush1.bf16.msra.mxu1 %v5324_v45  ;;  %v5411_v44 = vld [vmem:[#allocation5 + $0x6e0] ss:$16 sps:$4 sm:$0xff]   ;;  %v5414_v45 = vld [vmem:[#allocation5 + $0x6e8] ss:$16 sps:$4 sm:$0xff]  }
 0x122   :  { %3341 = vmatprep.subr.bf16.mxu0 %v5329_v46  ;;  %3669 = vmatprep.subr.bf16.mxu1 %v5332_v47  ;;  %v5419_v46 = vld [vmem:[#allocation5 + $0x704] ss:$16 sps:$4 sm:$0xff]   ;;  %v5422_v47 = vld [vmem:[#allocation5 + $0x70c] ss:$16 sps:$4 sm:$0xff]  }
 0x125   :  { %3342 = vmatpush1.bf16.msra.mxu0 %v5327_v48  ;;  %3670 = vmatpush1.bf16.msra.mxu1 %v5330_v49  ;;  %v5417_v48 = vld [vmem:[#allocation5 + $0x700] ss:$16 sps:$4 sm:$0xff]   ;;  %v5420_v49 = vld [vmem:[#allocation5 + $0x708] ss:$16 sps:$4 sm:$0xff]  }
 0x126   :  { %3343 = vmatprep.subr.bf16.mxu0 %v5335_v50  ;;  %3671 = vmatprep.subr.bf16.mxu1 %v5338_v51  ;;  %v5425_v50 = vld [vmem:[#allocation5 + $0x724] ss:$16 sps:$4 sm:$0xff]   ;;  %v5428_v51 = vld [vmem:[#allocation5 + $0x72c] ss:$16 sps:$4 sm:$0xff]  }
 0x129   :  { %3344 = vmatpush1.bf16.msra.mxu0 %v5333_v52  ;;  %3672 = vmatpush1.bf16.msra.mxu1 %v5336_v53  ;;  %v5423_v52 = vld [vmem:[#allocation5 + $0x720] ss:$16 sps:$4 sm:$0xff]   ;;  %v5426_v53 = vld [vmem:[#allocation5 + $0x728] ss:$16 sps:$4 sm:$0xff]  }
 0x12a   :  { %3345 = vmatprep.subr.bf16.mxu0 %v5341_v54  ;;  %3673 = vmatprep.subr.bf16.mxu1 %v5344_v55  ;;  %v5431_v54 = vld [vmem:[#allocation5 + $0x744] ss:$16 sps:$4 sm:$0xff]   ;;  %v5434_v55 = vld [vmem:[#allocation5 + $0x74c] ss:$16 sps:$4 sm:$0xff]  }
 0x12d   :  { %3346 = vmatpush1.bf16.msra.mxu0 %v5339_v56  ;;  %3674 = vmatpush1.bf16.msra.mxu1 %v5342_v57  ;;  %v5429_v56 = vld [vmem:[#allocation5 + $0x740] ss:$16 sps:$4 sm:$0xff]   ;;  %v5432_v57 = vld [vmem:[#allocation5 + $0x748] ss:$16 sps:$4 sm:$0xff]  }
 0x12e   :  { %3347 = vmatprep.subr.bf16.mxu0 %v5347_v58  ;;  %3675 = vmatprep.subr.bf16.mxu1 %v5350_v59  ;;  %v5437_v58 = vld [vmem:[#allocation5 + $0x764] ss:$16 sps:$4 sm:$0xff]   ;;  %v5440_v59 = vld [vmem:[#allocation5 + $0x76c] ss:$16 sps:$4 sm:$0xff]  }
 0x131   :  { %3348 = vmatpush1.bf16.msra.mxu0 %v5345_v60  ;;  %3676 = vmatpush1.bf16.msra.mxu1 %v5348_v61  ;;  %v5435_v60 = vld [vmem:[#allocation5 + $0x760] ss:$16 sps:$4 sm:$0xff]   ;;  %v5438_v61 = vld [vmem:[#allocation5 + $0x768] ss:$16 sps:$4 sm:$0xff]  }
 0x132   :  { %3349 = vmatprep.subr.bf16.mxu0 %v5353_v62  ;;  %3677 = vmatprep.subr.bf16.mxu1 %v5356_v63  ;;  %v5443_v62 = vld [vmem:[#allocation5 + $0x784] ss:$16 sps:$4 sm:$0xff]   ;;  %v5446_v63 = vld [vmem:[#allocation5 + $0x78c] ss:$16 sps:$4 sm:$0xff]  }
 0x135   :  { %3350 = vmatpush1.bf16.msra.mxu0 %v5351_v0  ;;  %3678 = vmatpush1.bf16.msra.mxu1 %v5354_v1  ;;  %v5441_v0 = vld [vmem:[#allocation5 + $0x780] ss:$16 sps:$4 sm:$0xff]   ;;  %v5444_v1 = vld [vmem:[#allocation5 + $0x788] ss:$16 sps:$4 sm:$0xff]  }
 0x136   :  { %3351 = vmatprep.subr.bf16.mxu0 %v5359_v2  ;;  %3679 = vmatprep.subr.bf16.mxu1 %v5362_v3  ;;  %v5449_v2 = vld [vmem:[#allocation5 + $0x7a4] ss:$16 sps:$4 sm:$0xff]   ;;  %v5452_v3 = vld [vmem:[#allocation5 + $0x7ac] ss:$16 sps:$4 sm:$0xff]  }
 0x139   :  { %3352 = vmatpush1.bf16.msra.mxu0 %v5357_v4  ;;  %3680 = vmatpush1.bf16.msra.mxu1 %v5360_v5  ;;  %v5447_v4 = vld [vmem:[#allocation5 + $0x7a0] ss:$16 sps:$4 sm:$0xff]   ;;  %v5450_v5 = vld [vmem:[#allocation5 + $0x7a8] ss:$16 sps:$4 sm:$0xff]  }
 0x13a   :  { %3353 = vmatprep.subr.bf16.mxu0 %v5365_v6  ;;  %3681 = vmatprep.subr.bf16.mxu1 %v5368_v7  ;;  %v5455_v6 = vld [vmem:[#allocation5 + $0x7c4] ss:$16 sps:$4 sm:$0xff]   ;;  %v5458_v7 = vld [vmem:[#allocation5 + $0x7cc] ss:$16 sps:$4 sm:$0xff]  }
 0x13d   :  { %3354 = vmatpush1.bf16.msra.mxu0 %v5363_v8  ;;  %3682 = vmatpush1.bf16.msra.mxu1 %v5366_v9  ;;  %v5453_v8 = vld [vmem:[#allocation5 + $0x7c0] ss:$16 sps:$4 sm:$0xff]   ;;  %v5456_v9 = vld [vmem:[#allocation5 + $0x7c8] ss:$16 sps:$4 sm:$0xff]  }
 0x13e   :  { %3364 = vmatprep.subr.bf16.mxu0 %v5371_v10  ;;  %3692 = vmatprep.subr.bf16.mxu1 %v5374_v12  ;;  %v5461_v10 = vld [vmem:[#allocation5 + $0x7e4] ss:$16 sps:$4 sm:$0xff]   ;;  %v5459_v12 = vld [vmem:[#allocation5 + $0x7e0] ss:$16 sps:$4 sm:$0xff]  }
 0x140   :  { %3356 = vmatmul.mubr.bf16.vlgmr.msra.gmra.mrb[0].mxu0 %v135_v15  ;;  %3684 = vmatmul.mubr.bf16.vlgmr.msra.gmra.mrb[0].mxu1 %v135_v15  ;;  %v5467_v15 = vld [vmem:[#allocation5 + $0x804] ss:$16 sps:$4 sm:$0xff]  }
 0x141   :  { %3365 = vmatpush1.bf16.msra.mxu0 %v5369_v13  ;;  %3693 = vmatpush1.bf16.msra.mxu1 %v5372_v14  ;;  %v5462_v13 = vld [vmem:[#allocation5 + $0x7e8] ss:$16 sps:$4 sm:$0xff]   ;;  %v121_v14 = vld [vmem:[#allocation2 + $0x30] sm:$0xff] }
 0x142   :  { %3366 = vmatprep.subr.bf16.mxu0 %v5377_v17  ;;  %3694 = vmatprep.subr.bf16.mxu1 %v5380_v18  ;;  %v137_v17 = vpack.c.bf16 %v121_v14, %v121_v14  ;;  %v124_v18 = vld [vmem:[#allocation2 + $0x48] sm:$0xff]  ;;  %v5557_v14 = vld [vmem:[#allocation5 + $0x9e4] ss:$16 sps:$4 sm:$0xff]  }
 0x143   :  { %3396 = vmatprep.mubr.bf16.mxu0 %v138_v19  ;;  %3724 = vmatprep.mubr.bf16.mxu1 %v138_v19  ;;  %v5465_v19 = vld [vmem:[#allocation5 + $0x800] ss:$16 sps:$4 sm:$0xff]  }
 0x145   :  { %3367 = vmatpush1.bf16.msra.mxu0 %v5375_v20  ;;  %3695 = vmatpush1.bf16.msra.mxu1 %v5378_v21  ;;  %v5468_v20 = vld [vmem:[#allocation5 + $0x808] ss:$16 sps:$4 sm:$0xff]   ;;  %v5473_v21 = vld [vmem:[#allocation5 + $0x824] ss:$16 sps:$4 sm:$0xff]  }
 0x146   :  { %3368 = vmatprep.subr.bf16.mxu0 %v5383_v22  ;;  %3696 = vmatprep.subr.bf16.mxu1 %v5386_v23  ;;  %v5476_v22 = vld [vmem:[#allocation5 + $0x82c] ss:$16 sps:$4 sm:$0xff]   ;;  %v140_v23 = vpack.c.bf16 %v124_v18, %v124_v18  ;;  %v5563_v18 = vld [vmem:[#allocation5 + $0xa04] ss:$16 sps:$4 sm:$0xff]  }
 0x149   :  { %3369 = vmatpush1.bf16.msra.mxu0 %v5381_v24  ;;  %3697 = vmatpush1.bf16.msra.mxu1 %v5384_v25  ;;  %v5471_v24 = vld [vmem:[#allocation5 + $0x820] ss:$16 sps:$4 sm:$0xff]   ;;  %v5474_v25 = vld [vmem:[#allocation5 + $0x828] ss:$16 sps:$4 sm:$0xff]  }
 0x14a   :  { %3370 = vmatprep.subr.bf16.mxu0 %v5389_v26  ;;  %3698 = vmatprep.subr.bf16.mxu1 %v5392_v27  ;;  %v5479_v26 = vld [vmem:[#allocation5 + $0x844] ss:$16 sps:$4 sm:$0xff]   ;;  %v5482_v27 = vld [vmem:[#allocation5 + $0x84c] ss:$16 sps:$4 sm:$0xff]  }
 0x14d   :  { %3371 = vmatpush1.bf16.msra.mxu0 %v5387_v28  ;;  %3699 = vmatpush1.bf16.msra.mxu1 %v5390_v29  ;;  %v5477_v28 = vld [vmem:[#allocation5 + $0x840] ss:$16 sps:$4 sm:$0xff]   ;;  %v5480_v29 = vld [vmem:[#allocation5 + $0x848] ss:$16 sps:$4 sm:$0xff]  }
 0x14e   :  { %3372 = vmatprep.subr.bf16.mxu0 %v5395_v30  ;;  %3700 = vmatprep.subr.bf16.mxu1 %v5398_v31  ;;  %v5485_v30 = vld [vmem:[#allocation5 + $0x864] ss:$16 sps:$4 sm:$0xff]   ;;  %v5488_v31 = vld [vmem:[#allocation5 + $0x86c] ss:$16 sps:$4 sm:$0xff]  }
 0x151   :  { %3373 = vmatpush1.bf16.msra.mxu0 %v5393_v32  ;;  %3701 = vmatpush1.bf16.msra.mxu1 %v5396_v33  ;;  %v5483_v32 = vld [vmem:[#allocation5 + $0x860] ss:$16 sps:$4 sm:$0xff]   ;;  %v5486_v33 = vld [vmem:[#allocation5 + $0x868] ss:$16 sps:$4 sm:$0xff]  }
 0x152   :  { %3374 = vmatprep.subr.bf16.mxu0 %v5401_v34  ;;  %3702 = vmatprep.subr.bf16.mxu1 %v5404_v35  ;;  %v5491_v34 = vld [vmem:[#allocation5 + $0x884] ss:$16 sps:$4 sm:$0xff]   ;;  %v5494_v35 = vld [vmem:[#allocation5 + $0x88c] ss:$16 sps:$4 sm:$0xff]  }
 0x155   :  { %3375 = vmatpush1.bf16.msra.mxu0 %v5399_v36  ;;  %3703 = vmatpush1.bf16.msra.mxu1 %v5402_v37  ;;  %v5489_v36 = vld [vmem:[#allocation5 + $0x880] ss:$16 sps:$4 sm:$0xff]   ;;  %v5492_v37 = vld [vmem:[#allocation5 + $0x888] ss:$16 sps:$4 sm:$0xff]  }
 0x156   :  { %3376 = vmatprep.subr.bf16.mxu0 %v5407_v38  ;;  %3704 = vmatprep.subr.bf16.mxu1 %v5410_v39  ;;  %v5497_v38 = vld [vmem:[#allocation5 + $0x8a4] ss:$16 sps:$4 sm:$0xff]   ;;  %v5500_v39 = vld [vmem:[#allocation5 + $0x8ac] ss:$16 sps:$4 sm:$0xff]  }
 0x159   :  { %3377 = vmatpush1.bf16.msra.mxu0 %v5405_v40  ;;  %3705 = vmatpush1.bf16.msra.mxu1 %v5408_v41  ;;  %v5495_v40 = vld [vmem:[#allocation5 + $0x8a0] ss:$16 sps:$4 sm:$0xff]   ;;  %v5498_v41 = vld [vmem:[#allocation5 + $0x8a8] ss:$16 sps:$4 sm:$0xff]  }
 0x15a   :  { %3378 = vmatprep.subr.bf16.mxu0 %v5413_v42  ;;  %3706 = vmatprep.subr.bf16.mxu1 %v5416_v43  ;;  %v5503_v42 = vld [vmem:[#allocation5 + $0x8c4] ss:$16 sps:$4 sm:$0xff]   ;;  %v5506_v43 = vld [vmem:[#allocation5 + $0x8cc] ss:$16 sps:$4 sm:$0xff]  }
 0x15d   :  { %3379 = vmatpush1.bf16.msra.mxu0 %v5411_v44  ;;  %3707 = vmatpush1.bf16.msra.mxu1 %v5414_v45  ;;  %v5501_v44 = vld [vmem:[#allocation5 + $0x8c0] ss:$16 sps:$4 sm:$0xff]   ;;  %v5504_v45 = vld [vmem:[#allocation5 + $0x8c8] ss:$16 sps:$4 sm:$0xff]  }
 0x15e   :  { %3380 = vmatprep.subr.bf16.mxu0 %v5419_v46  ;;  %3708 = vmatprep.subr.bf16.mxu1 %v5422_v47  ;;  %v5509_v46 = vld [vmem:[#allocation5 + $0x8e4] ss:$16 sps:$4 sm:$0xff]   ;;  %v5512_v47 = vld [vmem:[#allocation5 + $0x8ec] ss:$16 sps:$4 sm:$0xff]  }
 0x161   :  { %3381 = vmatpush1.bf16.msra.mxu0 %v5417_v48  ;;  %3709 = vmatpush1.bf16.msra.mxu1 %v5420_v49  ;;  %v5507_v48 = vld [vmem:[#allocation5 + $0x8e0] ss:$16 sps:$4 sm:$0xff]   ;;  %v5510_v49 = vld [vmem:[#allocation5 + $0x8e8] ss:$16 sps:$4 sm:$0xff]  }
 0x162   :  { %3382 = vmatprep.subr.bf16.mxu0 %v5425_v50  ;;  %3710 = vmatprep.subr.bf16.mxu1 %v5428_v51  ;;  %v5515_v50 = vld [vmem:[#allocation5 + $0x904] ss:$16 sps:$4 sm:$0xff]   ;;  %v5518_v51 = vld [vmem:[#allocation5 + $0x90c] ss:$16 sps:$4 sm:$0xff]  }
 0x165   :  { %3383 = vmatpush1.bf16.msra.mxu0 %v5423_v52  ;;  %3711 = vmatpush1.bf16.msra.mxu1 %v5426_v53  ;;  %v5513_v52 = vld [vmem:[#allocation5 + $0x900] ss:$16 sps:$4 sm:$0xff]   ;;  %v5516_v53 = vld [vmem:[#allocation5 + $0x908] ss:$16 sps:$4 sm:$0xff]  }
 0x166   :  { %3384 = vmatprep.subr.bf16.mxu0 %v5431_v54  ;;  %3712 = vmatprep.subr.bf16.mxu1 %v5434_v55  ;;  %v5521_v54 = vld [vmem:[#allocation5 + $0x924] ss:$16 sps:$4 sm:$0xff]   ;;  %v5524_v55 = vld [vmem:[#allocation5 + $0x92c] ss:$16 sps:$4 sm:$0xff]  }
 0x169   :  { %3385 = vmatpush1.bf16.msra.mxu0 %v5429_v56  ;;  %3713 = vmatpush1.bf16.msra.mxu1 %v5432_v57  ;;  %v5519_v56 = vld [vmem:[#allocation5 + $0x920] ss:$16 sps:$4 sm:$0xff]   ;;  %v5522_v57 = vld [vmem:[#allocation5 + $0x928] ss:$16 sps:$4 sm:$0xff]  }
 0x16a   :  { %3386 = vmatprep.subr.bf16.mxu0 %v5437_v58  ;;  %3714 = vmatprep.subr.bf16.mxu1 %v5440_v59  ;;  %v5527_v58 = vld [vmem:[#allocation5 + $0x944] ss:$16 sps:$4 sm:$0xff]   ;;  %v5530_v59 = vld [vmem:[#allocation5 + $0x94c] ss:$16 sps:$4 sm:$0xff]  }
 0x16d   :  { %3387 = vmatpush1.bf16.msra.mxu0 %v5435_v60  ;;  %3715 = vmatpush1.bf16.msra.mxu1 %v5438_v61  ;;  %v5525_v60 = vld [vmem:[#allocation5 + $0x940] ss:$16 sps:$4 sm:$0xff]   ;;  %v5528_v61 = vld [vmem:[#allocation5 + $0x948] ss:$16 sps:$4 sm:$0xff]  }
 0x16e   :  { %3388 = vmatprep.subr.bf16.mxu0 %v5443_v62  ;;  %3716 = vmatprep.subr.bf16.mxu1 %v5446_v63  ;;  %v5533_v62 = vld [vmem:[#allocation5 + $0x964] ss:$16 sps:$4 sm:$0xff]   ;;  %v5536_v63 = vld [vmem:[#allocation5 + $0x96c] ss:$16 sps:$4 sm:$0xff]  }
 0x171   :  { %3389 = vmatpush1.bf16.msra.mxu0 %v5441_v0  ;;  %3717 = vmatpush1.bf16.msra.mxu1 %v5444_v1  ;;  %v5531_v0 = vld [vmem:[#allocation5 + $0x960] ss:$16 sps:$4 sm:$0xff]   ;;  %v5534_v1 = vld [vmem:[#allocation5 + $0x968] ss:$16 sps:$4 sm:$0xff]  }
 0x172   :  { %3390 = vmatprep.subr.bf16.mxu0 %v5449_v2  ;;  %3718 = vmatprep.subr.bf16.mxu1 %v5452_v3  ;;  %v5539_v2 = vld [vmem:[#allocation5 + $0x984] ss:$16 sps:$4 sm:$0xff]   ;;  %v5542_v3 = vld [vmem:[#allocation5 + $0x98c] ss:$16 sps:$4 sm:$0xff]  }
 0x175   :  { %3391 = vmatpush1.bf16.msra.mxu0 %v5447_v4  ;;  %3719 = vmatpush1.bf16.msra.mxu1 %v5450_v5  ;;  %v5537_v4 = vld [vmem:[#allocation5 + $0x980] ss:$16 sps:$4 sm:$0xff]   ;;  %v5540_v5 = vld [vmem:[#allocation5 + $0x988] ss:$16 sps:$4 sm:$0xff]  }
 0x176   :  { %3392 = vmatprep.subr.bf16.mxu0 %v5455_v6  ;;  %3720 = vmatprep.subr.bf16.mxu1 %v5458_v7  ;;  %v5545_v6 = vld [vmem:[#allocation5 + $0x9a4] ss:$16 sps:$4 sm:$0xff]   ;;  %v5548_v7 = vld [vmem:[#allocation5 + $0x9ac] ss:$16 sps:$4 sm:$0xff]  }
 0x179   :  { %3393 = vmatpush1.bf16.msra.mxu0 %v5453_v8  ;;  %3721 = vmatpush1.bf16.msra.mxu1 %v5456_v9  ;;  %v5543_v8 = vld [vmem:[#allocation5 + $0x9a0] ss:$16 sps:$4 sm:$0xff]   ;;  %v5546_v9 = vld [vmem:[#allocation5 + $0x9a8] ss:$16 sps:$4 sm:$0xff]  }
 0x17a   :  { %3394 = vmatprep.subr.bf16.mxu0 %v5461_v10  ;;  %3722 = vmatprep.subr.bf16.mxu1 %v5464_v11  ;;  %v5551_v10 = vld [vmem:[#allocation5 + $0x9c4] ss:$16 sps:$4 sm:$0xff]   ;;  %v5554_v11 = vld [vmem:[#allocation5 + $0x9cc] ss:$16 sps:$4 sm:$0xff]  }
 0x17d   :  { %3395 = vmatpush1.bf16.msra.mxu0 %v5459_v12  ;;  %3723 = vmatpush1.bf16.msra.mxu1 %v5462_v13  ;;  %v5549_v12 = vld [vmem:[#allocation5 + $0x9c0] ss:$16 sps:$4 sm:$0xff]   ;;  %v5552_v13 = vld [vmem:[#allocation5 + $0x9c8] ss:$16 sps:$4 sm:$0xff]  }
 0x17e   :  { %3405 = vmatprep.subr.bf16.mxu0 %v5467_v15  ;;  %3733 = vmatprep.subr.bf16.mxu1 %v5470_v16  ;;  %v5560_v15 = vld [vmem:[#allocation5 + $0x9ec] ss:$16 sps:$4 sm:$0xff]   ;;  %v5555_v16 = vld [vmem:[#allocation5 + $0x9e0] ss:$16 sps:$4 sm:$0xff]  }
 0x180   :  { %3397 = vmatmul.mubr.bf16.vlgmr.msra.gmra.mrb[0].mxu0 %v137_v17  ;;  %3725 = vmatmul.mubr.bf16.vlgmr.msra.gmra.mrb[0].mxu1 %v137_v17  ;;  %v5558_v17 = vld [vmem:[#allocation5 + $0x9e8] ss:$16 sps:$4 sm:$0xff]  }
 0x181   :  { %3406 = vmatpush1.bf16.msra.mxu0 %v5465_v19  ;;  %3734 = vmatpush1.bf16.msra.mxu1 %v5468_v20  ;;  %v123_v19 = vld [vmem:[#allocation2 + $0x40] sm:$0xff]  ;;  %v5566_v20 = vld [vmem:[#allocation5 + $0xa0c] ss:$16 sps:$4 sm:$0xff]  }
 0x182   :  { %3407 = vmatprep.subr.bf16.mxu0 %v5473_v21  ;;  %3735 = vmatprep.subr.bf16.mxu1 %v5476_v22  ;;  %v126_v21 = vld [vmem:[#allocation2 + $0x58] sm:$0xff]  ;;  %v139_v22 = vpack.c.bf16 %v123_v19, %v123_v19 }
 0x183   :  { %3437 = vmatprep.mubr.bf16.mxu0 %v140_v23  ;;  %3765 = vmatprep.mubr.bf16.mxu1 %v140_v23  ;;  %v5561_v23 = vld [vmem:[#allocation5 + $0xa00] ss:$16 sps:$4 sm:$0xff]   ;;  %v5656_v19 = vld [vmem:[#allocation5 + $0xbec] ss:$16 sps:$4 sm:$0xff]  }
 0x185   :  { %3408 = vmatpush1.bf16.msra.mxu0 %v5471_v24  ;;  %3736 = vmatpush1.bf16.msra.mxu1 %v5474_v25  ;;  %v5564_v24 = vld [vmem:[#allocation5 + $0xa08] ss:$16 sps:$4 sm:$0xff]   ;;  %v5569_v25 = vld [vmem:[#allocation5 + $0xa24] ss:$16 sps:$4 sm:$0xff]  }
 0x186   :  { %3409 = vmatprep.subr.bf16.mxu0 %v5479_v26  ;;  %3737 = vmatprep.subr.bf16.mxu1 %v5482_v27  ;;  %v5572_v26 = vld [vmem:[#allocation5 + $0xa2c] ss:$16 sps:$4 sm:$0xff]   ;;  %v142_v27 = vpack.c.bf16 %v126_v21, %v126_v21  ;;  %v5654_v21 = vld [vmem:[#allocation5 + $0xbe8] ss:$16 sps:$4 sm:$0xff]  }
 0x189   :  { %3410 = vmatpush1.bf16.msra.mxu0 %v5477_v28  ;;  %3738 = vmatpush1.bf16.msra.mxu1 %v5480_v29  ;;  %v5567_v28 = vld [vmem:[#allocation5 + $0xa20] ss:$16 sps:$4 sm:$0xff]   ;;  %v5570_v29 = vld [vmem:[#allocation5 + $0xa28] ss:$16 sps:$4 sm:$0xff]  }
 0x18a   :  { %3411 = vmatprep.subr.bf16.mxu0 %v5485_v30  ;;  %3739 = vmatprep.subr.bf16.mxu1 %v5488_v31  ;;  %v5575_v30 = vld [vmem:[#allocation5 + $0xa44] ss:$16 sps:$4 sm:$0xff]   ;;  %v5578_v31 = vld [vmem:[#allocation5 + $0xa4c] ss:$16 sps:$4 sm:$0xff]  }
 0x18d   :  { %3412 = vmatpush1.bf16.msra.mxu0 %v5483_v32  ;;  %3740 = vmatpush1.bf16.msra.mxu1 %v5486_v33  ;;  %v5573_v32 = vld [vmem:[#allocation5 + $0xa40] ss:$16 sps:$4 sm:$0xff]   ;;  %v5576_v33 = vld [vmem:[#allocation5 + $0xa48] ss:$16 sps:$4 sm:$0xff]  }
 0x18e   :  { %3413 = vmatprep.subr.bf16.mxu0 %v5491_v34  ;;  %3741 = vmatprep.subr.bf16.mxu1 %v5494_v35  ;;  %v5581_v34 = vld [vmem:[#allocation5 + $0xa64] ss:$16 sps:$4 sm:$0xff]   ;;  %v5584_v35 = vld [vmem:[#allocation5 + $0xa6c] ss:$16 sps:$4 sm:$0xff]  }
 0x191   :  { %3414 = vmatpush1.bf16.msra.mxu0 %v5489_v36  ;;  %3742 = vmatpush1.bf16.msra.mxu1 %v5492_v37  ;;  %v5579_v36 = vld [vmem:[#allocation5 + $0xa60] ss:$16 sps:$4 sm:$0xff]   ;;  %v5582_v37 = vld [vmem:[#allocation5 + $0xa68] ss:$16 sps:$4 sm:$0xff]  }
 0x192   :  { %3415 = vmatprep.subr.bf16.mxu0 %v5497_v38  ;;  %3743 = vmatprep.subr.bf16.mxu1 %v5500_v39  ;;  %v5587_v38 = vld [vmem:[#allocation5 + $0xa84] ss:$16 sps:$4 sm:$0xff]   ;;  %v5590_v39 = vld [vmem:[#allocation5 + $0xa8c] ss:$16 sps:$4 sm:$0xff]  }
 0x195   :  { %3416 = vmatpush1.bf16.msra.mxu0 %v5495_v40  ;;  %3744 = vmatpush1.bf16.msra.mxu1 %v5498_v41  ;;  %v5585_v40 = vld [vmem:[#allocation5 + $0xa80] ss:$16 sps:$4 sm:$0xff]   ;;  %v5588_v41 = vld [vmem:[#allocation5 + $0xa88] ss:$16 sps:$4 sm:$0xff]  }
 0x196   :  { %3417 = vmatprep.subr.bf16.mxu0 %v5503_v42  ;;  %3745 = vmatprep.subr.bf16.mxu1 %v5506_v43  ;;  %v5593_v42 = vld [vmem:[#allocation5 + $0xaa4] ss:$16 sps:$4 sm:$0xff]   ;;  %v5596_v43 = vld [vmem:[#allocation5 + $0xaac] ss:$16 sps:$4 sm:$0xff]  }
 0x199   :  { %3418 = vmatpush1.bf16.msra.mxu0 %v5501_v44  ;;  %3746 = vmatpush1.bf16.msra.mxu1 %v5504_v45  ;;  %v5591_v44 = vld [vmem:[#allocation5 + $0xaa0] ss:$16 sps:$4 sm:$0xff]   ;;  %v5594_v45 = vld [vmem:[#allocation5 + $0xaa8] ss:$16 sps:$4 sm:$0xff]  }
 0x19a   :  { %3419 = vmatprep.subr.bf16.mxu0 %v5509_v46  ;;  %3747 = vmatprep.subr.bf16.mxu1 %v5512_v47  ;;  %v5599_v46 = vld [vmem:[#allocation5 + $0xac4] ss:$16 sps:$4 sm:$0xff]   ;;  %v5602_v47 = vld [vmem:[#allocation5 + $0xacc] ss:$16 sps:$4 sm:$0xff]  }
 0x19d   :  { %3420 = vmatpush1.bf16.msra.mxu0 %v5507_v48  ;;  %3748 = vmatpush1.bf16.msra.mxu1 %v5510_v49  ;;  %v5597_v48 = vld [vmem:[#allocation5 + $0xac0] ss:$16 sps:$4 sm:$0xff]   ;;  %v5600_v49 = vld [vmem:[#allocation5 + $0xac8] ss:$16 sps:$4 sm:$0xff]  }
 0x19e   :  { %3421 = vmatprep.subr.bf16.mxu0 %v5515_v50  ;;  %3749 = vmatprep.subr.bf16.mxu1 %v5518_v51  ;;  %v5605_v50 = vld [vmem:[#allocation5 + $0xae4] ss:$16 sps:$4 sm:$0xff]   ;;  %v5608_v51 = vld [vmem:[#allocation5 + $0xaec] ss:$16 sps:$4 sm:$0xff]  }
 0x1a1   :  { %3422 = vmatpush1.bf16.msra.mxu0 %v5513_v52  ;;  %3750 = vmatpush1.bf16.msra.mxu1 %v5516_v53  ;;  %v5603_v52 = vld [vmem:[#allocation5 + $0xae0] ss:$16 sps:$4 sm:$0xff]   ;;  %v5606_v53 = vld [vmem:[#allocation5 + $0xae8] ss:$16 sps:$4 sm:$0xff]  }
 0x1a2   :  { %3423 = vmatprep.subr.bf16.mxu0 %v5521_v54  ;;  %3751 = vmatprep.subr.bf16.mxu1 %v5524_v55  ;;  %v5611_v54 = vld [vmem:[#allocation5 + $0xb04] ss:$16 sps:$4 sm:$0xff]   ;;  %v5614_v55 = vld [vmem:[#allocation5 + $0xb0c] ss:$16 sps:$4 sm:$0xff]  }
 0x1a5   :  { %3424 = vmatpush1.bf16.msra.mxu0 %v5519_v56  ;;  %3752 = vmatpush1.bf16.msra.mxu1 %v5522_v57  ;;  %v5609_v56 = vld [vmem:[#allocation5 + $0xb00] ss:$16 sps:$4 sm:$0xff]   ;;  %v5612_v57 = vld [vmem:[#allocation5 + $0xb08] ss:$16 sps:$4 sm:$0xff]  }
 0x1a6   :  { %3425 = vmatprep.subr.bf16.mxu0 %v5527_v58  ;;  %3753 = vmatprep.subr.bf16.mxu1 %v5530_v59  ;;  %v5617_v58 = vld [vmem:[#allocation5 + $0xb24] ss:$16 sps:$4 sm:$0xff]   ;;  %v5620_v59 = vld [vmem:[#allocation5 + $0xb2c] ss:$16 sps:$4 sm:$0xff]  }
 0x1a9   :  { %3426 = vmatpush1.bf16.msra.mxu0 %v5525_v60  ;;  %3754 = vmatpush1.bf16.msra.mxu1 %v5528_v61  ;;  %v5615_v60 = vld [vmem:[#allocation5 + $0xb20] ss:$16 sps:$4 sm:$0xff]   ;;  %v5618_v61 = vld [vmem:[#allocation5 + $0xb28] ss:$16 sps:$4 sm:$0xff]  }
 0x1aa   :  { %3427 = vmatprep.subr.bf16.mxu0 %v5533_v62  ;;  %3755 = vmatprep.subr.bf16.mxu1 %v5536_v63  ;;  %v5623_v62 = vld [vmem:[#allocation5 + $0xb44] ss:$16 sps:$4 sm:$0xff]   ;;  %v5626_v63 = vld [vmem:[#allocation5 + $0xb4c] ss:$16 sps:$4 sm:$0xff]  }
 0x1ad   :  { %3428 = vmatpush1.bf16.msra.mxu0 %v5531_v0  ;;  %3756 = vmatpush1.bf16.msra.mxu1 %v5534_v1  ;;  %v5621_v0 = vld [vmem:[#allocation5 + $0xb40] ss:$16 sps:$4 sm:$0xff]   ;;  %v5624_v1 = vld [vmem:[#allocation5 + $0xb48] ss:$16 sps:$4 sm:$0xff]  }
 0x1ae   :  { %3429 = vmatprep.subr.bf16.mxu0 %v5539_v2  ;;  %3757 = vmatprep.subr.bf16.mxu1 %v5542_v3  ;;  %v5629_v2 = vld [vmem:[#allocation5 + $0xb64] ss:$16 sps:$4 sm:$0xff]   ;;  %v5632_v3 = vld [vmem:[#allocation5 + $0xb6c] ss:$16 sps:$4 sm:$0xff]  }
 0x1b1   :  { %3430 = vmatpush1.bf16.msra.mxu0 %v5537_v4  ;;  %3758 = vmatpush1.bf16.msra.mxu1 %v5540_v5  ;;  %v5627_v4 = vld [vmem:[#allocation5 + $0xb60] ss:$16 sps:$4 sm:$0xff]   ;;  %v5630_v5 = vld [vmem:[#allocation5 + $0xb68] ss:$16 sps:$4 sm:$0xff]  }
 0x1b2   :  { %3431 = vmatprep.subr.bf16.mxu0 %v5545_v6  ;;  %3759 = vmatprep.subr.bf16.mxu1 %v5548_v7  ;;  %v5635_v6 = vld [vmem:[#allocation5 + $0xb84] ss:$16 sps:$4 sm:$0xff]   ;;  %v5638_v7 = vld [vmem:[#allocation5 + $0xb8c] ss:$16 sps:$4 sm:$0xff]  }
 0x1b5   :  { %3432 = vmatpush1.bf16.msra.mxu0 %v5543_v8  ;;  %3760 = vmatpush1.bf16.msra.mxu1 %v5546_v9  ;;  %v5633_v8 = vld [vmem:[#allocation5 + $0xb80] ss:$16 sps:$4 sm:$0xff]   ;;  %v5636_v9 = vld [vmem:[#allocation5 + $0xb88] ss:$16 sps:$4 sm:$0xff]  }
 0x1b6   :  { %3433 = vmatprep.subr.bf16.mxu0 %v5551_v10  ;;  %3761 = vmatprep.subr.bf16.mxu1 %v5554_v11  ;;  %v5641_v10 = vld [vmem:[#allocation5 + $0xba4] ss:$16 sps:$4 sm:$0xff]   ;;  %v5644_v11 = vld [vmem:[#allocation5 + $0xbac] ss:$16 sps:$4 sm:$0xff]  }
 0x1b9   :  { %3434 = vmatpush1.bf16.msra.mxu0 %v5549_v12  ;;  %3762 = vmatpush1.bf16.msra.mxu1 %v5552_v13  ;;  %v5639_v12 = vld [vmem:[#allocation5 + $0xba0] ss:$16 sps:$4 sm:$0xff]   ;;  %v5642_v13 = vld [vmem:[#allocation5 + $0xba8] ss:$16 sps:$4 sm:$0xff]  }
 0x1ba   :  { %3435 = vmatprep.subr.bf16.mxu0 %v5557_v14  ;;  %3763 = vmatprep.subr.bf16.mxu1 %v5560_v15  ;;  %v5647_v14 = vld [vmem:[#allocation5 + $0xbc4] ss:$16 sps:$4 sm:$0xff]   ;;  %v5650_v15 = vld [vmem:[#allocation5 + $0xbcc] ss:$16 sps:$4 sm:$0xff]  }
 0x1bd   :  { %3436 = vmatpush1.bf16.msra.mxu0 %v5555_v16  ;;  %3764 = vmatpush1.bf16.msra.mxu1 %v5558_v17  ;;  %v5645_v16 = vld [vmem:[#allocation5 + $0xbc0] ss:$16 sps:$4 sm:$0xff]   ;;  %v5648_v17 = vld [vmem:[#allocation5 + $0xbc8] ss:$16 sps:$4 sm:$0xff]  }
 0x1be   :  { %3446 = vmatprep.subr.bf16.mxu0 %v5563_v18  ;;  %3774 = vmatprep.subr.bf16.mxu1 %v5566_v20  ;;  %v5653_v18 = vld [vmem:[#allocation5 + $0xbe4] ss:$16 sps:$4 sm:$0xff]   ;;  %v5651_v20 = vld [vmem:[#allocation5 + $0xbe0] ss:$16 sps:$4 sm:$0xff]  }
 0x1c0   :  { %3438 = vmatmul.mubr.bf16.vlgmr.msra.gmra.mrb[0].mxu0 %v139_v22  ;;  %3766 = vmatmul.mubr.bf16.vlgmr.msra.gmra.mrb[0].mxu1 %v139_v22  ;;  %v125_v22 = vld [vmem:[#allocation2 + $0x50] sm:$0xff] }
 0x1c1   :  { %3447 = vmatpush1.bf16.msra.mxu0 %v5561_v23  ;;  %3775 = vmatpush1.bf16.msra.mxu1 %v5564_v24  ;;  %v5659_v23 = vld [vmem:[#allocation5 + $0xc04] ss:$16 sps:$4 sm:$0xff]   ;;  %v5662_v24 = vld [vmem:[#allocation5 + $0xc0c] ss:$16 sps:$4 sm:$0xff]  }
 0x1c2   :  { %3448 = vmatprep.subr.bf16.mxu0 %v5569_v25  ;;  %3776 = vmatprep.subr.bf16.mxu1 %v5572_v26  ;;  %v141_v25 = vpack.c.bf16 %v125_v22, %v125_v22  ;;  %v128_v26 = vld [vmem:[#allocation2 + $0x68] sm:$0xff]  ;;  %v5749_v22 = vld [vmem:[#allocation5 + $0xde4] ss:$16 sps:$4 sm:$0xff]  }
 0x1c3   :  { %3478 = vmatprep.mubr.bf16.mxu0 %v142_v27  ;;  %3806 = vmatprep.mubr.bf16.mxu1 %v142_v27  ;;  %v5657_v27 = vld [vmem:[#allocation5 + $0xc00] ss:$16 sps:$4 sm:$0xff]  }
 0x1c5   :  { %3449 = vmatpush1.bf16.msra.mxu0 %v5567_v28  ;;  %3777 = vmatpush1.bf16.msra.mxu1 %v5570_v29  ;;  %v5660_v28 = vld [vmem:[#allocation5 + $0xc08] ss:$16 sps:$4 sm:$0xff]   ;;  %v5665_v29 = vld [vmem:[#allocation5 + $0xc24] ss:$16 sps:$4 sm:$0xff]  }
 0x1c6   :  { %3450 = vmatprep.subr.bf16.mxu0 %v5575_v30  ;;  %3778 = vmatprep.subr.bf16.mxu1 %v5578_v31  ;;  %v5668_v30 = vld [vmem:[#allocation5 + $0xc2c] ss:$16 sps:$4 sm:$0xff]   ;;  %v144_v31 = vpack.c.bf16 %v128_v26, %v128_v26  ;;  %v127_v26 = vld [vmem:[#allocation2 + $0x60] sm:$0xff] }
 0x1c9   :  { %3451 = vmatpush1.bf16.msra.mxu0 %v5573_v32  ;;  %3779 = vmatpush1.bf16.msra.mxu1 %v5576_v33  ;;  %v5663_v32 = vld [vmem:[#allocation5 + $0xc20] ss:$16 sps:$4 sm:$0xff]   ;;  %v5666_v33 = vld [vmem:[#allocation5 + $0xc28] ss:$16 sps:$4 sm:$0xff]  }
 0x1ca   :  { %3452 = vmatprep.subr.bf16.mxu0 %v5581_v34  ;;  %3780 = vmatprep.subr.bf16.mxu1 %v5584_v35  ;;  %v5671_v34 = vld [vmem:[#allocation5 + $0xc44] ss:$16 sps:$4 sm:$0xff]   ;;  %v5674_v35 = vld [vmem:[#allocation5 + $0xc4c] ss:$16 sps:$4 sm:$0xff]  }
 0x1cd   :  { %3453 = vmatpush1.bf16.msra.mxu0 %v5579_v36  ;;  %3781 = vmatpush1.bf16.msra.mxu1 %v5582_v37  ;;  %v5669_v36 = vld [vmem:[#allocation5 + $0xc40] ss:$16 sps:$4 sm:$0xff]   ;;  %v5672_v37 = vld [vmem:[#allocation5 + $0xc48] ss:$16 sps:$4 sm:$0xff]  }
 0x1ce   :  { %3454 = vmatprep.subr.bf16.mxu0 %v5587_v38  ;;  %3782 = vmatprep.subr.bf16.mxu1 %v5590_v39  ;;  %v5677_v38 = vld [vmem:[#allocation5 + $0xc64] ss:$16 sps:$4 sm:$0xff]   ;;  %v5680_v39 = vld [vmem:[#allocation5 + $0xc6c] ss:$16 sps:$4 sm:$0xff]  }
 0x1d1   :  { %3455 = vmatpush1.bf16.msra.mxu0 %v5585_v40  ;;  %3783 = vmatpush1.bf16.msra.mxu1 %v5588_v41  ;;  %v5675_v40 = vld [vmem:[#allocation5 + $0xc60] ss:$16 sps:$4 sm:$0xff]   ;;  %v5678_v41 = vld [vmem:[#allocation5 + $0xc68] ss:$16 sps:$4 sm:$0xff]  }
 0x1d2   :  { %3456 = vmatprep.subr.bf16.mxu0 %v5593_v42  ;;  %3784 = vmatprep.subr.bf16.mxu1 %v5596_v43  ;;  %v5683_v42 = vld [vmem:[#allocation5 + $0xc84] ss:$16 sps:$4 sm:$0xff]   ;;  %v5686_v43 = vld [vmem:[#allocation5 + $0xc8c] ss:$16 sps:$4 sm:$0xff]  }
 0x1d5   :  { %3457 = vmatpush1.bf16.msra.mxu0 %v5591_v44  ;;  %3785 = vmatpush1.bf16.msra.mxu1 %v5594_v45  ;;  %v5681_v44 = vld [vmem:[#allocation5 + $0xc80] ss:$16 sps:$4 sm:$0xff]   ;;  %v5684_v45 = vld [vmem:[#allocation5 + $0xc88] ss:$16 sps:$4 sm:$0xff]  }
 0x1d6   :  { %3458 = vmatprep.subr.bf16.mxu0 %v5599_v46  ;;  %3786 = vmatprep.subr.bf16.mxu1 %v5602_v47  ;;  %v5689_v46 = vld [vmem:[#allocation5 + $0xca4] ss:$16 sps:$4 sm:$0xff]   ;;  %v5692_v47 = vld [vmem:[#allocation5 + $0xcac] ss:$16 sps:$4 sm:$0xff]  }
 0x1d9   :  { %3459 = vmatpush1.bf16.msra.mxu0 %v5597_v48  ;;  %3787 = vmatpush1.bf16.msra.mxu1 %v5600_v49  ;;  %v5687_v48 = vld [vmem:[#allocation5 + $0xca0] ss:$16 sps:$4 sm:$0xff]   ;;  %v5690_v49 = vld [vmem:[#allocation5 + $0xca8] ss:$16 sps:$4 sm:$0xff]  }
 0x1da   :  { %3460 = vmatprep.subr.bf16.mxu0 %v5605_v50  ;;  %3788 = vmatprep.subr.bf16.mxu1 %v5608_v51  ;;  %v5695_v50 = vld [vmem:[#allocation5 + $0xcc4] ss:$16 sps:$4 sm:$0xff]   ;;  %v5698_v51 = vld [vmem:[#allocation5 + $0xccc] ss:$16 sps:$4 sm:$0xff]  }
 0x1dd   :  { %3461 = vmatpush1.bf16.msra.mxu0 %v5603_v52  ;;  %3789 = vmatpush1.bf16.msra.mxu1 %v5606_v53  ;;  %v5693_v52 = vld [vmem:[#allocation5 + $0xcc0] ss:$16 sps:$4 sm:$0xff]   ;;  %v5696_v53 = vld [vmem:[#allocation5 + $0xcc8] ss:$16 sps:$4 sm:$0xff]  }
 0x1de   :  { %3462 = vmatprep.subr.bf16.mxu0 %v5611_v54  ;;  %3790 = vmatprep.subr.bf16.mxu1 %v5614_v55  ;;  %v5701_v54 = vld [vmem:[#allocation5 + $0xce4] ss:$16 sps:$4 sm:$0xff]   ;;  %v5704_v55 = vld [vmem:[#allocation5 + $0xcec] ss:$16 sps:$4 sm:$0xff]  }
 0x1e1   :  { %3463 = vmatpush1.bf16.msra.mxu0 %v5609_v56  ;;  %3791 = vmatpush1.bf16.msra.mxu1 %v5612_v57  ;;  %v5699_v56 = vld [vmem:[#allocation5 + $0xce0] ss:$16 sps:$4 sm:$0xff]   ;;  %v5702_v57 = vld [vmem:[#allocation5 + $0xce8] ss:$16 sps:$4 sm:$0xff]  }
 0x1e2   :  { %3464 = vmatprep.subr.bf16.mxu0 %v5617_v58  ;;  %3792 = vmatprep.subr.bf16.mxu1 %v5620_v59  ;;  %v5707_v58 = vld [vmem:[#allocation5 + $0xd04] ss:$16 sps:$4 sm:$0xff]   ;;  %v5710_v59 = vld [vmem:[#allocation5 + $0xd0c] ss:$16 sps:$4 sm:$0xff]  }
 0x1e5   :  { %3465 = vmatpush1.bf16.msra.mxu0 %v5615_v60  ;;  %3793 = vmatpush1.bf16.msra.mxu1 %v5618_v61  ;;  %v5705_v60 = vld [vmem:[#allocation5 + $0xd00] ss:$16 sps:$4 sm:$0xff]   ;;  %v5708_v61 = vld [vmem:[#allocation5 + $0xd08] ss:$16 sps:$4 sm:$0xff]  }
 0x1e6   :  { %3466 = vmatprep.subr.bf16.mxu0 %v5623_v62  ;;  %3794 = vmatprep.subr.bf16.mxu1 %v5626_v63  ;;  %v5713_v62 = vld [vmem:[#allocation5 + $0xd24] ss:$16 sps:$4 sm:$0xff]   ;;  %v5716_v63 = vld [vmem:[#allocation5 + $0xd2c] ss:$16 sps:$4 sm:$0xff]  }
 0x1e9   :  { %3467 = vmatpush1.bf16.msra.mxu0 %v5621_v0  ;;  %3795 = vmatpush1.bf16.msra.mxu1 %v5624_v1  ;;  %v5711_v0 = vld [vmem:[#allocation5 + $0xd20] ss:$16 sps:$4 sm:$0xff]   ;;  %v5714_v1 = vld [vmem:[#allocation5 + $0xd28] ss:$16 sps:$4 sm:$0xff]  }
 0x1ea   :  { %3468 = vmatprep.subr.bf16.mxu0 %v5629_v2  ;;  %3796 = vmatprep.subr.bf16.mxu1 %v5632_v3  ;;  %v5719_v2 = vld [vmem:[#allocation5 + $0xd44] ss:$16 sps:$4 sm:$0xff]   ;;  %v5722_v3 = vld [vmem:[#allocation5 + $0xd4c] ss:$16 sps:$4 sm:$0xff]  }
 0x1ed   :  { %3469 = vmatpush1.bf16.msra.mxu0 %v5627_v4  ;;  %3797 = vmatpush1.bf16.msra.mxu1 %v5630_v5  ;;  %v5717_v4 = vld [vmem:[#allocation5 + $0xd40] ss:$16 sps:$4 sm:$0xff]   ;;  %v5720_v5 = vld [vmem:[#allocation5 + $0xd48] ss:$16 sps:$4 sm:$0xff]  }
 0x1ee   :  { %3470 = vmatprep.subr.bf16.mxu0 %v5635_v6  ;;  %3798 = vmatprep.subr.bf16.mxu1 %v5638_v7  ;;  %v5725_v6 = vld [vmem:[#allocation5 + $0xd64] ss:$16 sps:$4 sm:$0xff]   ;;  %v5728_v7 = vld [vmem:[#allocation5 + $0xd6c] ss:$16 sps:$4 sm:$0xff]  }
 0x1f1   :  { %3471 = vmatpush1.bf16.msra.mxu0 %v5633_v8  ;;  %3799 = vmatpush1.bf16.msra.mxu1 %v5636_v9  ;;  %v5723_v8 = vld [vmem:[#allocation5 + $0xd60] ss:$16 sps:$4 sm:$0xff]   ;;  %v5726_v9 = vld [vmem:[#allocation5 + $0xd68] ss:$16 sps:$4 sm:$0xff]  }
 0x1f2   :  { %3472 = vmatprep.subr.bf16.mxu0 %v5641_v10  ;;  %3800 = vmatprep.subr.bf16.mxu1 %v5644_v11  ;;  %v5731_v10 = vld [vmem:[#allocation5 + $0xd84] ss:$16 sps:$4 sm:$0xff]   ;;  %v5734_v11 = vld [vmem:[#allocation5 + $0xd8c] ss:$16 sps:$4 sm:$0xff]  }
 0x1f5   :  { %3473 = vmatpush1.bf16.msra.mxu0 %v5639_v12  ;;  %3801 = vmatpush1.bf16.msra.mxu1 %v5642_v13  ;;  %v5729_v12 = vld [vmem:[#allocation5 + $0xd80] ss:$16 sps:$4 sm:$0xff]   ;;  %v5732_v13 = vld [vmem:[#allocation5 + $0xd88] ss:$16 sps:$4 sm:$0xff]  }
 0x1f6   :  { %3474 = vmatprep.subr.bf16.mxu0 %v5647_v14  ;;  %3802 = vmatprep.subr.bf16.mxu1 %v5650_v15  ;;  %v5737_v14 = vld [vmem:[#allocation5 + $0xda4] ss:$16 sps:$4 sm:$0xff]   ;;  %v5740_v15 = vld [vmem:[#allocation5 + $0xdac] ss:$16 sps:$4 sm:$0xff]  }
 0x1f9   :  { %3475 = vmatpush1.bf16.msra.mxu0 %v5645_v16  ;;  %3803 = vmatpush1.bf16.msra.mxu1 %v5648_v17  ;;  %v5735_v16 = vld [vmem:[#allocation5 + $0xda0] ss:$16 sps:$4 sm:$0xff]   ;;  %v5738_v17 = vld [vmem:[#allocation5 + $0xda8] ss:$16 sps:$4 sm:$0xff]  }
 0x1fa   :  { %3476 = vmatprep.subr.bf16.mxu0 %v5653_v18  ;;  %3804 = vmatprep.subr.bf16.mxu1 %v5656_v19  ;;  %v5743_v18 = vld [vmem:[#allocation5 + $0xdc4] ss:$16 sps:$4 sm:$0xff]   ;;  %v5746_v19 = vld [vmem:[#allocation5 + $0xdcc] ss:$16 sps:$4 sm:$0xff]  }
 0x1fd   :  { %3477 = vmatpush1.bf16.msra.mxu0 %v5651_v20  ;;  %3805 = vmatpush1.bf16.msra.mxu1 %v5654_v21  ;;  %v5741_v20 = vld [vmem:[#allocation5 + $0xdc0] ss:$16 sps:$4 sm:$0xff]   ;;  %v5744_v21 = vld [vmem:[#allocation5 + $0xdc8] ss:$16 sps:$4 sm:$0xff]  }
 0x1fe   :  { %3487 = vmatprep.subr.bf16.mxu0 %v5659_v23  ;;  %3815 = vmatprep.subr.bf16.mxu1 %v5662_v24  ;;  %v5752_v23 = vld [vmem:[#allocation5 + $0xdec] ss:$16 sps:$4 sm:$0xff]   ;;  %v5747_v24 = vld [vmem:[#allocation5 + $0xde0] ss:$16 sps:$4 sm:$0xff]  }
 0x200   :  { %3479 = vmatmul.mubr.bf16.vlgmr.msra.gmra.mrb[0].mxu0 %v141_v25  ;;  %3807 = vmatmul.mubr.bf16.vlgmr.msra.gmra.mrb[0].mxu1 %v141_v25  ;;  %v5750_v25 = vld [vmem:[#allocation5 + $0xde8] ss:$16 sps:$4 sm:$0xff]  }
 0x201   :  { %3488 = vmatpush1.bf16.msra.mxu0 %v5657_v27  ;;  %3816 = vmatpush1.bf16.msra.mxu1 %v5660_v28  ;;  %v5755_v27 = vld [vmem:[#allocation5 + $0xe04] ss:$16 sps:$4 sm:$0xff]   ;;  %v5758_v28 = vld [vmem:[#allocation5 + $0xe0c] ss:$16 sps:$4 sm:$0xff]  }
 0x202   :  { %3489 = vmatprep.subr.bf16.mxu0 %v5665_v29  ;;  %3817 = vmatprep.subr.bf16.mxu1 %v5668_v30  ;;  %v143_v29 = vpack.c.bf16 %v127_v26, %v127_v26  ;;  %v130_v30 = vld [vmem:[#allocation2 + $0x78] sm:$0xff]  ;;  %v5845_v26 = vld [vmem:[#allocation5 + $0xfe4] ss:$16 sps:$4 sm:$0xff]  }
 0x203   :  { %3519 = vmatprep.mubr.bf16.mxu0 %v144_v31  ;;  %3847 = vmatprep.mubr.bf16.mxu1 %v144_v31  ;;  %v5753_v31 = vld [vmem:[#allocation5 + $0xe00] ss:$16 sps:$4 sm:$0xff]  }
 0x205   :  { %3490 = vmatpush1.bf16.msra.mxu0 %v5663_v32  ;;  %3818 = vmatpush1.bf16.msra.mxu1 %v5666_v33  ;;  %v5756_v32 = vld [vmem:[#allocation5 + $0xe08] ss:$16 sps:$4 sm:$0xff]   ;;  %v5761_v33 = vld [vmem:[#allocation5 + $0xe24] ss:$16 sps:$4 sm:$0xff]  }
 0x206   :  { %3491 = vmatprep.subr.bf16.mxu0 %v5671_v34  ;;  %3819 = vmatprep.subr.bf16.mxu1 %v5674_v35  ;;  %v5764_v34 = vld [vmem:[#allocation5 + $0xe2c] ss:$16 sps:$4 sm:$0xff]   ;;  %v146_v35 = vpack.c.bf16 %v130_v30, %v130_v30  ;;  %v129_v30 = vld [vmem:[#allocation2 + $0x70] sm:$0xff] }
 0x209   :  { %3492 = vmatpush1.bf16.msra.mxu0 %v5669_v36  ;;  %3820 = vmatpush1.bf16.msra.mxu1 %v5672_v37  ;;  %v5759_v36 = vld [vmem:[#allocation5 + $0xe20] ss:$16 sps:$4 sm:$0xff]   ;;  %v5762_v37 = vld [vmem:[#allocation5 + $0xe28] ss:$16 sps:$4 sm:$0xff]  }
 0x20a   :  { %3493 = vmatprep.subr.bf16.mxu0 %v5677_v38  ;;  %3821 = vmatprep.subr.bf16.mxu1 %v5680_v39  ;;  %v5767_v38 = vld [vmem:[#allocation5 + $0xe44] ss:$16 sps:$4 sm:$0xff]   ;;  %v5770_v39 = vld [vmem:[#allocation5 + $0xe4c] ss:$16 sps:$4 sm:$0xff]  }
 0x20d   :  { %3494 = vmatpush1.bf16.msra.mxu0 %v5675_v40  ;;  %3822 = vmatpush1.bf16.msra.mxu1 %v5678_v41  ;;  %v5765_v40 = vld [vmem:[#allocation5 + $0xe40] ss:$16 sps:$4 sm:$0xff]   ;;  %v5768_v41 = vld [vmem:[#allocation5 + $0xe48] ss:$16 sps:$4 sm:$0xff]  }
 0x20e   :  { %3495 = vmatprep.subr.bf16.mxu0 %v5683_v42  ;;  %3823 = vmatprep.subr.bf16.mxu1 %v5686_v43  ;;  %v5773_v42 = vld [vmem:[#allocation5 + $0xe64] ss:$16 sps:$4 sm:$0xff]   ;;  %v5776_v43 = vld [vmem:[#allocation5 + $0xe6c] ss:$16 sps:$4 sm:$0xff]  }
 0x211   :  { %3496 = vmatpush1.bf16.msra.mxu0 %v5681_v44  ;;  %3824 = vmatpush1.bf16.msra.mxu1 %v5684_v45  ;;  %v5771_v44 = vld [vmem:[#allocation5 + $0xe60] ss:$16 sps:$4 sm:$0xff]   ;;  %v5774_v45 = vld [vmem:[#allocation5 + $0xe68] ss:$16 sps:$4 sm:$0xff]  }
 0x212   :  { %3497 = vmatprep.subr.bf16.mxu0 %v5689_v46  ;;  %3825 = vmatprep.subr.bf16.mxu1 %v5692_v47  ;;  %v5779_v46 = vld [vmem:[#allocation5 + $0xe84] ss:$16 sps:$4 sm:$0xff]   ;;  %v5782_v47 = vld [vmem:[#allocation5 + $0xe8c] ss:$16 sps:$4 sm:$0xff]  }
 0x215   :  { %3498 = vmatpush1.bf16.msra.mxu0 %v5687_v48  ;;  %3826 = vmatpush1.bf16.msra.mxu1 %v5690_v49  ;;  %v5777_v48 = vld [vmem:[#allocation5 + $0xe80] ss:$16 sps:$4 sm:$0xff]   ;;  %v5780_v49 = vld [vmem:[#allocation5 + $0xe88] ss:$16 sps:$4 sm:$0xff]  }
 0x216   :  { %3499 = vmatprep.subr.bf16.mxu0 %v5695_v50  ;;  %3827 = vmatprep.subr.bf16.mxu1 %v5698_v51  ;;  %v5785_v50 = vld [vmem:[#allocation5 + $0xea4] ss:$16 sps:$4 sm:$0xff]   ;;  %v5788_v51 = vld [vmem:[#allocation5 + $0xeac] ss:$16 sps:$4 sm:$0xff]  }
 0x219   :  { %3500 = vmatpush1.bf16.msra.mxu0 %v5693_v52  ;;  %3828 = vmatpush1.bf16.msra.mxu1 %v5696_v53  ;;  %v5783_v52 = vld [vmem:[#allocation5 + $0xea0] ss:$16 sps:$4 sm:$0xff]   ;;  %v5786_v53 = vld [vmem:[#allocation5 + $0xea8] ss:$16 sps:$4 sm:$0xff]  }
 0x21a   :  { %3501 = vmatprep.subr.bf16.mxu0 %v5701_v54  ;;  %3829 = vmatprep.subr.bf16.mxu1 %v5704_v55  ;;  %v5791_v54 = vld [vmem:[#allocation5 + $0xec4] ss:$16 sps:$4 sm:$0xff]   ;;  %v5794_v55 = vld [vmem:[#allocation5 + $0xecc] ss:$16 sps:$4 sm:$0xff]  }
 0x21d   :  { %3502 = vmatpush1.bf16.msra.mxu0 %v5699_v56  ;;  %3830 = vmatpush1.bf16.msra.mxu1 %v5702_v57  ;;  %v5789_v56 = vld [vmem:[#allocation5 + $0xec0] ss:$16 sps:$4 sm:$0xff]   ;;  %v5792_v57 = vld [vmem:[#allocation5 + $0xec8] ss:$16 sps:$4 sm:$0xff]  }
 0x21e   :  { %3503 = vmatprep.subr.bf16.mxu0 %v5707_v58  ;;  %3831 = vmatprep.subr.bf16.mxu1 %v5710_v59  ;;  %v5797_v58 = vld [vmem:[#allocation5 + $0xee4] ss:$16 sps:$4 sm:$0xff]   ;;  %v5800_v59 = vld [vmem:[#allocation5 + $0xeec] ss:$16 sps:$4 sm:$0xff]  }
 0x221   :  { %3504 = vmatpush1.bf16.msra.mxu0 %v5705_v60  ;;  %3832 = vmatpush1.bf16.msra.mxu1 %v5708_v61  ;;  %v5795_v60 = vld [vmem:[#allocation5 + $0xee0] ss:$16 sps:$4 sm:$0xff]   ;;  %v5798_v61 = vld [vmem:[#allocation5 + $0xee8] ss:$16 sps:$4 sm:$0xff]  }
 0x222   :  { %3505 = vmatprep.subr.bf16.mxu0 %v5713_v62  ;;  %3833 = vmatprep.subr.bf16.mxu1 %v5716_v63  ;;  %v5803_v62 = vld [vmem:[#allocation5 + $0xf04] ss:$16 sps:$4 sm:$0xff]   ;;  %v5806_v63 = vld [vmem:[#allocation5 + $0xf0c] ss:$16 sps:$4 sm:$0xff]  }
 0x225   :  { %3506 = vmatpush1.bf16.msra.mxu0 %v5711_v0  ;;  %3834 = vmatpush1.bf16.msra.mxu1 %v5714_v1  ;;  %v5801_v0 = vld [vmem:[#allocation5 + $0xf00] ss:$16 sps:$4 sm:$0xff]   ;;  %v5804_v1 = vld [vmem:[#allocation5 + $0xf08] ss:$16 sps:$4 sm:$0xff]  }
 0x226   :  { %3507 = vmatprep.subr.bf16.mxu0 %v5719_v2  ;;  %3835 = vmatprep.subr.bf16.mxu1 %v5722_v3  ;;  %v5809_v2 = vld [vmem:[#allocation5 + $0xf24] ss:$16 sps:$4 sm:$0xff]   ;;  %v5812_v3 = vld [vmem:[#allocation5 + $0xf2c] ss:$16 sps:$4 sm:$0xff]  }
 0x229   :  { %3508 = vmatpush1.bf16.msra.mxu0 %v5717_v4  ;;  %3836 = vmatpush1.bf16.msra.mxu1 %v5720_v5  ;;  %v5807_v4 = vld [vmem:[#allocation5 + $0xf20] ss:$16 sps:$4 sm:$0xff]   ;;  %v5810_v5 = vld [vmem:[#allocation5 + $0xf28] ss:$16 sps:$4 sm:$0xff]  }
 0x22a   :  { %3509 = vmatprep.subr.bf16.mxu0 %v5725_v6  ;;  %3837 = vmatprep.subr.bf16.mxu1 %v5728_v7  ;;  %v5815_v6 = vld [vmem:[#allocation5 + $0xf44] ss:$16 sps:$4 sm:$0xff]   ;;  %v5818_v7 = vld [vmem:[#allocation5 + $0xf4c] ss:$16 sps:$4 sm:$0xff]  }
 0x22d   :  { %3510 = vmatpush1.bf16.msra.mxu0 %v5723_v8  ;;  %3838 = vmatpush1.bf16.msra.mxu1 %v5726_v9  ;;  %v5813_v8 = vld [vmem:[#allocation5 + $0xf40] ss:$16 sps:$4 sm:$0xff]   ;;  %v5816_v9 = vld [vmem:[#allocation5 + $0xf48] ss:$16 sps:$4 sm:$0xff]  }
 0x22e   :  { %3511 = vmatprep.subr.bf16.mxu0 %v5731_v10  ;;  %3839 = vmatprep.subr.bf16.mxu1 %v5734_v11  ;;  %v5821_v10 = vld [vmem:[#allocation5 + $0xf64] ss:$16 sps:$4 sm:$0xff]   ;;  %v5824_v11 = vld [vmem:[#allocation5 + $0xf6c] ss:$16 sps:$4 sm:$0xff]  }
 0x231   :  { %3512 = vmatpush1.bf16.msra.mxu0 %v5729_v12  ;;  %3840 = vmatpush1.bf16.msra.mxu1 %v5732_v13  ;;  %v5819_v12 = vld [vmem:[#allocation5 + $0xf60] ss:$16 sps:$4 sm:$0xff]   ;;  %v5822_v13 = vld [vmem:[#allocation5 + $0xf68] ss:$16 sps:$4 sm:$0xff]  }
 0x232   :  { %3513 = vmatprep.subr.bf16.mxu0 %v5737_v14  ;;  %3841 = vmatprep.subr.bf16.mxu1 %v5740_v15  ;;  %v5827_v14 = vld [vmem:[#allocation5 + $0xf84] ss:$16 sps:$4 sm:$0xff]   ;;  %v5830_v15 = vld [vmem:[#allocation5 + $0xf8c] ss:$16 sps:$4 sm:$0xff]  }
 0x235   :  { %3514 = vmatpush1.bf16.msra.mxu0 %v5735_v16  ;;  %3842 = vmatpush1.bf16.msra.mxu1 %v5738_v17  ;;  %v5825_v16 = vld [vmem:[#allocation5 + $0xf80] ss:$16 sps:$4 sm:$0xff]   ;;  %v5828_v17 = vld [vmem:[#allocation5 + $0xf88] ss:$16 sps:$4 sm:$0xff]  }
 0x236   :  { %3515 = vmatprep.subr.bf16.mxu0 %v5743_v18  ;;  %3843 = vmatprep.subr.bf16.mxu1 %v5746_v19  ;;  %v5833_v18 = vld [vmem:[#allocation5 + $0xfa4] ss:$16 sps:$4 sm:$0xff]   ;;  %v5836_v19 = vld [vmem:[#allocation5 + $0xfac] ss:$16 sps:$4 sm:$0xff]  }
 0x239   :  { %3516 = vmatpush1.bf16.msra.mxu0 %v5741_v20  ;;  %3844 = vmatpush1.bf16.msra.mxu1 %v5744_v21  ;;  %v5831_v20 = vld [vmem:[#allocation5 + $0xfa0] ss:$16 sps:$4 sm:$0xff]   ;;  %v5834_v21 = vld [vmem:[#allocation5 + $0xfa8] ss:$16 sps:$4 sm:$0xff]  }
 0x23a   :  { %3517 = vmatprep.subr.bf16.mxu0 %v5749_v22  ;;  %3845 = vmatprep.subr.bf16.mxu1 %v5752_v23  ;;  %v5839_v22 = vld [vmem:[#allocation5 + $0xfc4] ss:$16 sps:$4 sm:$0xff]   ;;  %v5842_v23 = vld [vmem:[#allocation5 + $0xfcc] ss:$16 sps:$4 sm:$0xff]  }
 0x23d   :  { %3518 = vmatpush1.bf16.msra.mxu0 %v5747_v24  ;;  %3846 = vmatpush1.bf16.msra.mxu1 %v5750_v25  ;;  %v5837_v24 = vld [vmem:[#allocation5 + $0xfc0] ss:$16 sps:$4 sm:$0xff]   ;;  %v5840_v25 = vld [vmem:[#allocation5 + $0xfc8] ss:$16 sps:$4 sm:$0xff]  }
 0x23e   :  { %3528 = vmatprep.subr.bf16.mxu0 %v5755_v27  ;;  %3856 = vmatprep.subr.bf16.mxu1 %v5758_v28  ;;  %v5848_v27 = vld [vmem:[#allocation5 + $0xfec] ss:$16 sps:$4 sm:$0xff]   ;;  %v5843_v28 = vld [vmem:[#allocation5 + $0xfe0] ss:$16 sps:$4 sm:$0xff]  }
 0x240   :  { %3520 = vmatmul.mubr.bf16.vlgmr.msra.gmra.mrb[0].mxu0 %v143_v29  ;;  %3848 = vmatmul.mubr.bf16.vlgmr.msra.gmra.mrb[0].mxu1 %v143_v29  ;;  %v5846_v29 = vld [vmem:[#allocation5 + $0xfe8] ss:$16 sps:$4 sm:$0xff]  }
 0x241   :  { %3529 = vmatpush1.bf16.msra.mxu0 %v5753_v31  ;;  %3857 = vmatpush1.bf16.msra.mxu1 %v5756_v32  ;;  %v5849_v31 = vld [vmem:[#allocation8 + $0x40] sm:$0xff]  }
 0x242   :  { %3530 = vmatprep.subr.bf16.mxu0 %v5761_v33  ;;  %3858 = vmatprep.subr.bf16.mxu1 %v5764_v34  ;;  %v5850_v32 = vld [vmem:[#allocation8 + $0xc0] sm:$0xff]   ;;  %v145_v33 = vpack.c.bf16 %v129_v30, %v129_v30 }
 0x243   :  { %3560 = vmatprep.mubr.bf16.mxu0 %v146_v35  ;;  %3888 = vmatprep.mubr.bf16.mxu1 %v146_v35  ;;  %v5851_v34 = vld [vmem:[#allocation8] sm:$0xff]  }
 0x244   :  { %v5852_v35 = vld [vmem:[#allocation8 + $0x80] sm:$0xff]  }
 0x245   :  { %3531 = vmatpush1.bf16.msra.mxu0 %v5759_v36  ;;  %3859 = vmatpush1.bf16.msra.mxu1 %v5762_v37  ;;  %v5853_v36 = vld [vmem:[#allocation8 + $0x48] sm:$0xff]  }
 0x246   :  { %3532 = vmatprep.subr.bf16.mxu0 %v5767_v38  ;;  %3860 = vmatprep.subr.bf16.mxu1 %v5770_v39  ;;  %v5854_v37 = vld [vmem:[#allocation8 + $0xc8] sm:$0xff]  }
 0x247   :  { %v5855_v38 = vld [vmem:[#allocation8 + $0x8] sm:$0xff]  }
 0x248   :  { %v5856_v39 = vld [vmem:[#allocation8 + $0x88] sm:$0xff]  }
 0x249   :  { %3533 = vmatpush1.bf16.msra.mxu0 %v5765_v40  ;;  %3861 = vmatpush1.bf16.msra.mxu1 %v5768_v41  ;;  %v5857_v40 = vld [vmem:[#allocation8 + $0x50] sm:$0xff]   ;;  %v5881_v30 = vld [vmem:[#allocation11] sm:$0xff]  }
 0x24a   :  { %3534 = vmatprep.subr.bf16.mxu0 %v5773_v42  ;;  %3862 = vmatprep.subr.bf16.mxu1 %v5776_v43  ;;  %v5858_v41 = vld [vmem:[#allocation8 + $0xd0] sm:$0xff]  }
 0x24b   :  { %v5859_v42 = vld [vmem:[#allocation8 + $0x10] sm:$0xff]  }
 0x24c   :  { %v5860_v43 = vld [vmem:[#allocation8 + $0x90] sm:$0xff]  }
 0x24d   :  { %3535 = vmatpush1.bf16.msra.mxu0 %v5771_v44  ;;  %3863 = vmatpush1.bf16.msra.mxu1 %v5774_v45  ;;  %v5861_v44 = vld [vmem:[#allocation8 + $0x58] sm:$0xff]  }
 0x24e   :  { %3536 = vmatprep.subr.bf16.mxu0 %v5779_v46  ;;  %3864 = vmatprep.subr.bf16.mxu1 %v5782_v47  ;;  %v5862_v45 = vld [vmem:[#allocation8 + $0xd8] sm:$0xff]  }
 0x24f   :  { %v5863_v46 = vld [vmem:[#allocation8 + $0x18] sm:$0xff]  }
 0x250   :  { %v5864_v47 = vld [vmem:[#allocation8 + $0x98] sm:$0xff]  }
 0x251   :  { %3537 = vmatpush1.bf16.msra.mxu0 %v5777_v48  ;;  %3865 = vmatpush1.bf16.msra.mxu1 %v5780_v49  ;;  %v5865_v48 = vld [vmem:[#allocation8 + $0x60] sm:$0xff]  }
 0x252   :  { %3538 = vmatprep.subr.bf16.mxu0 %v5785_v50  ;;  %3866 = vmatprep.subr.bf16.mxu1 %v5788_v51  ;;  %v5866_v49 = vld [vmem:[#allocation8 + $0xe0] sm:$0xff]  }
 0x253   :  { %v5867_v50 = vld [vmem:[#allocation8 + $0x20] sm:$0xff]  }
 0x254   :  { %v5868_v51 = vld [vmem:[#allocation8 + $0xa0] sm:$0xff]  }
 0x255   :  { %3539 = vmatpush1.bf16.msra.mxu0 %v5783_v52  ;;  %3867 = vmatpush1.bf16.msra.mxu1 %v5786_v53  ;;  %v5869_v52 = vld [vmem:[#allocation8 + $0x68] sm:$0xff]  }
 0x256   :  { %3540 = vmatprep.subr.bf16.mxu0 %v5791_v54  ;;  %3868 = vmatprep.subr.bf16.mxu1 %v5794_v55  ;;  %v5870_v53 = vld [vmem:[#allocation8 + $0xe8] sm:$0xff]  }
 0x257   :  { %v5871_v54 = vld [vmem:[#allocation8 + $0x28] sm:$0xff]  }
 0x258   :  { %v5872_v55 = vld [vmem:[#allocation8 + $0xa8] sm:$0xff]  }
 0x259   :  { %3541 = vmatpush1.bf16.msra.mxu0 %v5789_v56  ;;  %3869 = vmatpush1.bf16.msra.mxu1 %v5792_v57  ;;  %v5873_v56 = vld [vmem:[#allocation8 + $0x70] sm:$0xff]  }
 0x25a   :  { %3542 = vmatprep.subr.bf16.mxu0 %v5797_v58  ;;  %3870 = vmatprep.subr.bf16.mxu1 %v5800_v59  ;;  %v5874_v57 = vld [vmem:[#allocation8 + $0xf0] sm:$0xff]  }
 0x25b   :  { %v5875_v58 = vld [vmem:[#allocation8 + $0x30] sm:$0xff]  }
 0x25c   :  { %v5876_v59 = vld [vmem:[#allocation8 + $0xb0] sm:$0xff]  }
 0x25d   :  { %3543 = vmatpush1.bf16.msra.mxu0 %v5795_v60  ;;  %3871 = vmatpush1.bf16.msra.mxu1 %v5798_v61  ;;  %v5877_v60 = vld [vmem:[#allocation8 + $0x78] sm:$0xff]  }
 0x25e   :  { %3544 = vmatprep.subr.bf16.mxu0 %v5803_v62  ;;  %3872 = vmatprep.subr.bf16.mxu1 %v5806_v63  ;;  %v5878_v61 = vld [vmem:[#allocation8 + $0xf8] sm:$0xff]  }
 0x25f   :  { %v5879_v62 = vld [vmem:[#allocation8 + $0x38] sm:$0xff]  }
 0x260   :  { %v5880_v63 = vld [vmem:[#allocation8 + $0xb8] sm:$0xff]  }
 0x261   :  { %3545 = vmatpush1.bf16.msra.mxu0 %v5801_v0  ;;  %3873 = vmatpush1.bf16.msra.mxu1 %v5804_v1  ;;  %v6086_v0 = vmov 0.0   ;;  %v661_v1 = vlaneseq }
 0x262   :  { %3546 = vmatprep.subr.bf16.mxu0 %v5809_v2  ;;  %3874 = vmatprep.subr.bf16.mxu1 %v5812_v3 }
 0x263   :  { %v662_v2 = vshrl.u32 %v661_v1, 7 }
 0x265   :  { %3547 = vmatpush1.bf16.msra.mxu0 %v5807_v4  ;;  %3875 = vmatpush1.bf16.msra.mxu1 %v5810_v5  ;;  %v663_v3 = vsub.s32 0, %v662_v2  ;;  %v671_v4 = vsub.s32 2, %v662_v2  ;;  %v659_v5 = vld [vmem:[#allocation7] sm:$0xf] }
 0x266   :  { %3548 = vmatprep.subr.bf16.mxu0 %v5815_v6  ;;  %3876 = vmatprep.subr.bf16.mxu1 %v5818_v7  ;;  %v667_v6 = vsub.s32 1, %v662_v2  ;;  %v675_v7 = vsub.s32 3, %v662_v2 }
 0x269   :  { %3549 = vmatpush1.bf16.msra.mxu0 %v5813_v8  ;;  %3877 = vmatpush1.bf16.msra.mxu1 %v5816_v9  ;;  %v664_v8 = vrot.slane %v659_v5, %v663_v3  ;;  %v672_v9 = vrot.slane %v659_v5, %v671_v4 }
 0x26a   :  { %3550 = vmatprep.subr.bf16.mxu0 %v5821_v10  ;;  %3878 = vmatprep.subr.bf16.mxu1 %v5824_v11  ;;  %v668_v10 = vrot.slane %v659_v5, %v667_v6  ;;  %v676_v11 = vrot.slane %v659_v5, %v675_v7 }
 0x26d   :  { %3551 = vmatpush1.bf16.msra.mxu0 %v5819_v12  ;;  %3879 = vmatpush1.bf16.msra.mxu1 %v5822_v13 }
 0x26e   :  { %3552 = vmatprep.subr.bf16.mxu0 %v5827_v14  ;;  %3880 = vmatprep.subr.bf16.mxu1 %v5830_v15 }
 0x271   :  { %3553 = vmatpush1.bf16.msra.mxu0 %v5825_v16  ;;  %3881 = vmatpush1.bf16.msra.mxu1 %v5828_v17 }
 0x272   :  { %3554 = vmatprep.subr.bf16.mxu0 %v5833_v18  ;;  %3882 = vmatprep.subr.bf16.mxu1 %v5836_v19 }
 0x275   :  { %3555 = vmatpush1.bf16.msra.mxu0 %v5831_v20  ;;  %3883 = vmatpush1.bf16.msra.mxu1 %v5834_v21 }
 0x276   :  { %3556 = vmatprep.subr.bf16.mxu0 %v5839_v22  ;;  %3884 = vmatprep.subr.bf16.mxu1 %v5842_v23 }
 0x279   :  { %3557 = vmatpush1.bf16.msra.mxu0 %v5837_v24  ;;  %3885 = vmatpush1.bf16.msra.mxu1 %v5840_v25 }
 0x27a   :  { %3558 = vmatprep.subr.bf16.mxu0 %v5845_v26  ;;  %3886 = vmatprep.subr.bf16.mxu1 %v5848_v27 }
 0x27d   :  { %3559 = vmatpush1.bf16.msra.mxu0 %v5843_v28  ;;  %3887 = vmatpush1.bf16.msra.mxu1 %v5846_v29 }
 0x27e   :  { %4934 = vmatprep.subr.bf16.mxu0 %v5849_v31  ;;  %4956 = vmatprep.subr.bf16.mxu1 %v5850_v32 }
 0x280   :  { %3561 = vmatmul.mubr.bf16.vlgmr.msra.gmra.mrb[0].mxu0 %v145_v33  ;;  %3889 = vmatmul.mubr.bf16.vlgmr.msra.gmra.mrb[0].mxu1 %v145_v33  ;;  %v5882_v33 = vld [vmem:[#allocation11 + $0x8] sm:$0xff]  }
 0x281   :  { %4935 = vmatpush3.bf16.msra.mxu0 %v5851_v34  ;;  %4957 = vmatpush3.bf16.msra.mxu1 %v5852_v35  ;;  %v5883_v34 = vld [vmem:[#allocation11 + $0x10] sm:$0xff]   ;;  %v5884_v35 = vld [vmem:[#allocation11 + $0x18] sm:$0xff]  }
 0x282   :  { %4936 = vmatprep.subr.bf16.mxu0 %v5853_v36  ;;  %4958 = vmatprep.subr.bf16.mxu1 %v5854_v37  ;;  %v5885_v36 = vld [vmem:[#allocation11 + $0x20] sm:$0xff]   ;;  %v5886_v37 = vld [vmem:[#allocation11 + $0x28] sm:$0xff]  }
 0x285   :  { %4937 = vmatpush3.bf16.msra.mxu0 %v5855_v38  ;;  %4959 = vmatpush3.bf16.msra.mxu1 %v5856_v39  ;;  %v5887_v38 = vld [vmem:[#allocation11 + $0x30] sm:$0xff]   ;;  %v5888_v39 = vld [vmem:[#allocation11 + $0x38] sm:$0xff]  }
 0x286   :  { %4938 = vmatprep.subr.bf16.mxu0 %v5857_v40  ;;  %4960 = vmatprep.subr.bf16.mxu1 %v5858_v41 }
 0x289   :  { %4939 = vmatpush3.bf16.msra.mxu0 %v5859_v42  ;;  %4961 = vmatpush3.bf16.msra.mxu1 %v5860_v43  ;;  %v4892_v42 = vld [vmem:[#allocation10] ss:$0 sm:$0xff] }
 0x28a   :  { %4940 = vmatprep.subr.bf16.mxu0 %v5861_v44  ;;  %4962 = vmatprep.subr.bf16.mxu1 %v5862_v45 }
 0x28d   :  { %4941 = vmatpush3.bf16.msra.mxu0 %v5863_v46  ;;  %4963 = vmatpush3.bf16.msra.mxu1 %v5864_v47 }
 0x28e   :  { %4942 = vmatprep.subr.bf16.mxu0 %v5865_v48  ;;  %4964 = vmatprep.subr.bf16.mxu1 %v5866_v49 }
 0x291   :  { %4943 = vmatpush3.bf16.msra.mxu0 %v5867_v50  ;;  %4965 = vmatpush3.bf16.msra.mxu1 %v5868_v51 }
 0x292   :  { %4944 = vmatprep.subr.bf16.mxu0 %v5869_v52  ;;  %4966 = vmatprep.subr.bf16.mxu1 %v5870_v53 }
 0x295   :  { %4945 = vmatpush3.bf16.msra.mxu0 %v5871_v54  ;;  %4967 = vmatpush3.bf16.msra.mxu1 %v5872_v55  ;;  %v4925_v55 = vld [vmem:[#allocation13] ss:$0 sm:$0xff] }
 0x296   :  { %4946 = vmatprep.subr.bf16.mxu0 %v5873_v56  ;;  %4968 = vmatprep.subr.bf16.mxu1 %v5874_v57 }
 0x299   :  { %4947 = vmatpush3.bf16.msra.mxu0 %v5875_v58  ;;  %4969 = vmatpush3.bf16.msra.mxu1 %v5876_v59 }
 0x29a   :  { %4948 = vmatprep.subr.bf16.mxu0 %v5877_v60  ;;  %4970 = vmatprep.subr.bf16.mxu1 %v5878_v61 }
 0x29d   :  { %4949 = vmatpush3.bf16.msra.mxu0 %v5879_v62  ;;  %4971 = vmatpush3.bf16.msra.mxu1 %v5880_v63 }
 0x29e   :  { %4987 = vmatprep.subr.bf16.mxu0 %v6086_v0 }
 0x353   :  { %v3562_v12 = vpop.f32.mrb[0].mxu0  ;;  %v3890_v13 = vpop.f32.mrb[0].mxu1 }
 0x354   :  { %v5007_v14 = vadd.f32 %v3562_v12, %v664_v8  ;;  %v5009_v15 = vadd.f32 %v3890_v13, %v672_v9  ;;  %v3564_v16 = vpop.f32.mrb[1].mxu0  ;;  %v3892_v17 = vpop.f32.mrb[1].mxu1 }
 0x355   :  { %v5008_v18 = vadd.f32 %v3564_v16, %v668_v10  ;;  %v5010_v19 = vadd.f32 %v3892_v17, %v676_v11  ;;  %v3566_v20 = vpop.f32.mrb[2].mxu0  ;;  %v3894_v21 = vpop.f32.mrb[2].mxu1 }
 0x356   :  { %v3897_v22 = vmax.f32 %v5007_v14, 0.0  ;;  %v3899_v23 = vmax.f32 %v5009_v15, 0.0  ;;  %v3567_v24 = vpop.f32.mrb[3].mxu0  ;;  %v3895_v25 = vpop.f32.mrb[3].mxu1 }
 0x357   :  { %v3898_v26 = vmax.f32 %v5008_v18, 0.0  ;;  %v3900_v27 = vmax.f32 %v5010_v19, 0.0 }
 0x358   :  { %v3901_v31 = vpack.c.bf16 %v3897_v22, %v3897_v22  ;;  %v3903_v32 = vpack.c.bf16 %v3899_v23, %v3899_v23 }
 0x359   :  { %v3902_v28 = vpack.c.bf16 %v3898_v26, %v3898_v26  ;;  %v3904_v29 = vpack.c.bf16 %v3900_v27, %v3900_v27 }
 0x35b   :  { %4200 = vmatprep.mubr.bf16.mxu0 %v3902_v28  ;;  %4240 = vmatprep.mubr.bf16.mxu1 %v3904_v29 }
 0x35c   :  { %4201 = vmatmul.mubr.bf16.vlgmr.msra.gmra.mrb[4].mxu0 %v3901_v31  ;;  %4241 = vmatmul.mubr.bf16.vlgmr.msra.gmra.mrb[4].mxu1 %v3903_v32 }
 0x35d   :  { %4988 = vmatpush3.bf16.msra.mxu0 %v5881_v30  ;;  %5003 = vmatprep.mubr.msk.bf16.mxu0 %vm6087_vm0, %v6086_v0 }
 0x35e   :  { %4989 = vmatprep.subr.bf16.mxu0 %v6086_v0 }
 0x361   :  { %4990 = vmatpush3.bf16.msra.mxu0 %v5882_v33 }
 0x362   :  { %4991 = vmatprep.subr.bf16.mxu0 %v6086_v0 }
 0x365   :  { %4992 = vmatpush3.bf16.msra.mxu0 %v5883_v34 }
 0x366   :  { %4993 = vmatprep.subr.bf16.mxu0 %v6086_v0 }
 0x369   :  { %4994 = vmatpush3.bf16.msra.mxu0 %v5884_v35 }
 0x36a   :  { %4995 = vmatprep.subr.bf16.mxu0 %v6086_v0 }
 0x36d   :  { %4996 = vmatpush3.bf16.msra.mxu0 %v5885_v36 }
 0x36e   :  { %4997 = vmatprep.subr.bf16.mxu0 %v6086_v0 }
 0x371   :  { %4998 = vmatpush3.bf16.msra.mxu0 %v5886_v37 }
 0x372   :  { %4999 = vmatprep.subr.bf16.mxu0 %v6086_v0 }
 0x375   :  { %5000 = vmatpush3.bf16.msra.mxu0 %v5887_v38 }
 0x376   :  { %5001 = vmatprep.subr.bf16.mxu0 %v6086_v0 }
 0x379   :  { %5002 = vmatpush3.bf16.msra.mxu0 %v5888_v39 }
 0x42f   :  { %v4950_v40 = vpop.f32.mrb[4].mxu0  ;;  %v4972_v41 = vpop.f32.mrb[4].mxu1 }
 0x430   :  { %v4951_v43 = vpop.f32.mrb[5].mxu0  ;;  %v4973_v44 = vpop.f32.mrb[5].mxu1 }
 0x431   :  { %v4952_v45 = vadd.f32 %v4951_v43, %v4950_v40  ;;  %v4974_v46 = vadd.f32 %v4973_v44, %v4972_v41  ;;  %v4953_v47 = vpop.f32.mrb[6].mxu0  ;;  %v4975_v48 = vpop.f32.mrb[6].mxu1 }
 0x432   :  { %v4954_v49 = vpop.f32.mrb[7].mxu0  ;;  %v4976_v50 = vpop.f32.mrb[7].mxu1 }
 0x433   :  { %v4203_v51 = vadd.f32 %v4952_v45, %v4892_v42 }
 0x435   :  { %v4243_v52 = vadd.f32 %v4974_v46, %v4203_v51 }
 0x437   :  { %v4248_v53 = vmax.f32 %v4243_v52, 0.0 }
 0x439   :  { %v4249_v54 = vpack.c.bf16 %v4248_v53, %v4248_v53 }
 0x43b   :  { %5004 = vmatmul.mubr.bf16.vlgmr.msra.gmra.mrb[8].mxu0 %v4249_v54 }
 0x50e   :  { %v4355_v56 = vpop.f32.mrb[8].mxu0 }
 0x50f   :  { %v4356_v57 = vadd.f32 %v4925_v55, %v4355_v56  ;;  %v5005_v58 = vpop.f32.mrb[9].mxu0 }
 0x510   :  { %v4358_v59 = vpop.f32.mrb[10].mxu0 }
 0x511   :  { %4361 = vst [vmem:[#allocation14] sm:$0xff] %v4356_v57  ;;  %v5006_v60 = vpop.f32.mrb[11].mxu0 }
 0x512   :  { %6054 = shalt.err (!%p6051_p4)
}
 0x513   :  { %s6055_s15 = scalar_lea.hbm %s6232_s7, 128 }
 0x514   :  { %p6056_p5 = scmp.ne.s32.totalorder %s6232_s7, %s6055_s15  ;;  %p6059_p6 = scmp.lt.u32.totalorder %s6055_s15, %s6232_s7 }
 0x516   :  { %p6061_p7 = pnand %p6059_p6, %p6056_p5 }
 0x518   :  { %6064 = shalt.err (!%p6061_p7)
}
 0x519   :  { %4371 = dma.vmem_to_hbm [thread:$0]  %s4369_s13, 128, %s6232_s7, [#allocation4]  }
 0x51a   :  { %6073 = dma.done.wait [#allocation4], 128  }
 0x51b   :  { %6074 = vsyncadd [#allocation4], 4294967168 }
 0x51c   :  { %4375 = vsyncpa [#allocation3], 1 }
 0x51d   :  { %4376 = vsyncpa [#allocation6], 1 }
 0x51e   :  { %4377 = vsyncpa [#allocation9], 1 }
 0x51f   :  { %4378 = vsyncpa [#allocation12], 1 }
 0x520   :  { %4379 = vsyncpa [#allocation4], 1 }

</bundles_post_ra>
